<compile_context>
chip_gen: v5e
topology: v5e:2x2
jax: 0.10.0
libtpu: 0.0.40
codegen_flags: <defaults>
</compile_context>

<pallas_src>
import math

import jax
import jax.numpy as jnp
from jax import lax
from jax.experimental import pallas as pl
from jax.experimental.pallas import tpu as pltpu


# ----------------------------- config ---------------------------------------
B = 2          # batch
T = 8          # seq_len == block_size
H = 32         # hidden_dim
N_HEAD = 4
HEAD = H // N_HEAD
FF = 4 * H
LN_EPS = 1e-5
BT = B * T
NEG_INF = -1e30


def _layernorm(x, w, b):
    # torch.nn.LayerNorm: biased variance, eps inside sqrt
    mu = jnp.mean(x, axis=-1, keepdims=True)
    xc = x - mu
    var = jnp.mean(xc * xc, axis=-1, keepdims=True)
    return xc * lax.rsqrt(var + LN_EPS) * w + b


def _gelu_exact(x):
    # torch.nn.GELU() default = exact erf formulation
    return 0.5 * x * (1.0 + lax.erf(x * (1.0 / math.sqrt(2.0))))


# ----------------------------- Pallas kernel --------------------------------
def block_kernel(x_ref, vec_ref, wqkv_ref, bqkv_ref, wproj_ref,
                 w1_ref, b1_ref, w2_ref, o_ref):
    x = x_ref[...].astype(jnp.float32)              # (BT, H)  batch*seq flattened
    vec = vec_ref[...].astype(jnp.float32)          # (6, H) packed vectors
    ln1_w, ln1_b = vec[0:1, :], vec[1:2, :]
    ln2_w, ln2_b = vec[2:3, :], vec[3:4, :]
    bproj, b2 = vec[4:5, :], vec[5:6, :]

    # ---- x + MultiHeadAttention(ln1(x)) ----
    h1 = _layernorm(x, ln1_w, ln1_b)                # (BT, H)
    qkv = jnp.dot(h1, wqkv_ref[...],
                  preferred_element_type=jnp.float32) + bqkv_ref[...]   # (BT, 3H)
    q = qkv[:, 0 * H:1 * H].reshape(B, T, H)
    k = qkv[:, 1 * H:2 * H].reshape(B, T, H)
    v = qkv[:, 2 * H:3 * H].reshape(B, T, H)

    # causal mask: keep where row >= col (diagonal always unmasked)
    row = lax.broadcasted_iota(jnp.int32, (T, T), 0)
    col = lax.broadcasted_iota(jnp.int32, (T, T), 1)
    causal = (row >= col)[None, :, :]               # (1, T, T)

    # Heads: batched over B via 3-D einsums; the concat over heads is replaced
    # by accumulating each head's partial projection through its row-block of
    # Wproj.  Static Python loop of 4 -> fully unrolled in the trace.
    att_acc = jnp.zeros((BT, H), jnp.float32)
    for h in range(N_HEAD):
        sl = slice(h * HEAD, (h + 1) * HEAD)
        qh, kh, vh = q[:, :, sl], k[:, :, sl], v[:, :, sl]     # (B, T, HEAD)
        s = jnp.einsum('bqd,bkd->bqk', qh, kh,
                       preferred_element_type=jnp.float32)     # (B, T, T)
        s = jnp.where(causal, s, NEG_INF)
        # softmax along last dim (the post-softmax 1/sqrt(H) scale is applied
        # once on the accumulated projection below -- mathematically identical).
        s = s - jnp.max(s, axis=-1, keepdims=True)
        p = jnp.exp(s)
        p = p * pl.reciprocal(jnp.sum(p, axis=-1, keepdims=True), approx=False)
        oh = jnp.einsum('bqk,bkd->bqd', p, vh,
                        preferred_element_type=jnp.float32)    # (B, T, HEAD)
        att_acc = att_acc + jnp.dot(oh.reshape(BT, HEAD), wproj_ref[sl, :],
                                    preferred_element_type=jnp.float32)

    x = x + att_acc * (1.0 / math.sqrt(H)) + bproj

    # ---- x + FFN(ln2(x)) ----
    h2 = _layernorm(x, ln2_w, ln2_b)
    f = jnp.dot(h2, w1_ref[...],
                preferred_element_type=jnp.float32) + b1_ref[...]
    f = _gelu_exact(f)
    f = jnp.dot(f, w2_ref[...],
                preferred_element_type=jnp.float32) + b2

    o_ref[...] = (x + f).astype(o_ref.dtype)


def block_forward(x, params):
    (ln1_w, ln1_b, wq, bq, wk, bk, wv, bv, wproj, bproj,
     ln2_w, ln2_b, w1, b1, w2, b2) = params

    # Operand packing (would be folded offline in practice): 17 -> 8 operands.
    vec = jnp.concatenate([ln1_w, ln1_b, ln2_w, ln2_b, bproj, b2], axis=0)  # (6, H)
    wqkv = jnp.concatenate([wq, wk, wv], axis=1)                            # (H, 3H)
    bqkv = jnp.concatenate([bq, bk, bv], axis=1)                            # (1, 3H)
    x2 = x.reshape(BT, H)

    full = lambda shape: pl.BlockSpec(shape, lambda i: (0, 0))

    grid_spec = pltpu.PrefetchScalarGridSpec(
        num_scalar_prefetch=0,
        grid=(1,),                        # single invocation: whole problem fits
        in_specs=[
            full((BT, H)),                # x (batch*seq flattened)
            full((6, H)),                 # packed ln1/ln2/bproj/b2 vectors
            full((H, 3 * H)),             # wqkv
            full((1, 3 * H)),             # bqkv
            full((H, H)),                 # wproj
            full((H, FF)),                # w1
            full((1, FF)),                # b1
            full((FF, H)),                # w2
        ],
        out_specs=pl.BlockSpec((BT, H), lambda i: (0, 0)),
    )

    out = pl.pallas_call(
        block_kernel,
        out_shape=jax.ShapeDtypeStruct((BT, H), x.dtype),
        grid_spec=grid_spec,
        compiler_params=pltpu.CompilerParams(
            dimension_semantics=("arbitrary",)),
    )(x2, vec, wqkv, bqkv, wproj, w1, b1, w2)
    return out.reshape(B, T, H)


# ----------------------------- pure-JAX reference ----------------------------
def block_reference(x, params):
    (ln1_w, ln1_b, wq, bq, wk, bk, wv, bv, wproj, bproj,
     ln2_w, ln2_b, w1, b1, w2, b2) = params
    h1 = _layernorm(x, ln1_w, ln1_b)
    q = h1 @ wq + bq
    k = h1 @ wk + bk
    v = h1 @ wv + bv
    row = jnp.arange(T)[:, None]
    col = jnp.arange(T)[None, :]
    causal = row >= col
    outs = []
    for h in range(N_HEAD):
        qh = q[..., h * HEAD:(h + 1) * HEAD]
        kh = k[..., h * HEAD:(h + 1) * HEAD]
        vh = v[..., h * HEAD:(h + 1) * HEAD]
        s = jnp.einsum("btd,bsd->bts", qh, kh)
        s = jnp.where(causal, s, -jnp.inf)
        p = jax.nn.softmax(s, axis=-1) / math.sqrt(H)
        outs.append(jnp.einsum("bts,bsd->btd", p, vh))
    att = jnp.concatenate(outs, axis=-1) @ wproj + bproj
    x = x + att
    h2 = _layernorm(x, ln2_w, ln2_b)
    f = _gelu_exact(h2 @ w1 + b1) @ w2 + b2
    return x + f


# ----------------------------- param init -----------------------------------
def init_params(key):
    ks = jax.random.split(key, 10)
    s = 0.05
    ln1_w = jnp.ones((1, H), jnp.float32)
    ln1_b = jnp.zeros((1, H), jnp.float32)
    ln2_w = jnp.ones((1, H), jnp.float32)
    ln2_b = jnp.zeros((1, H), jnp.float32)
    wq = s * jax.random.normal(ks[0], (H, H), jnp.float32)
    wk = s * jax.random.normal(ks[1], (H, H), jnp.float32)
    wv = s * jax.random.normal(ks[2], (H, H), jnp.float32)
    bq = s * jax.random.normal(ks[3], (1, H), jnp.float32)
    bk = s * jax.random.normal(ks[4], (1, H), jnp.float32)
    bv = s * jax.random.normal(ks[5], (1, H), jnp.float32)
    wproj = s * jax.random.normal(ks[6], (H, H), jnp.float32)
    bproj = jnp.zeros((1, H), jnp.float32)
    w1 = s * jax.random.normal(ks[7], (H, FF), jnp.float32)
    b1 = s * jax.random.normal(ks[8], (1, FF), jnp.float32)
    w2 = s * jax.random.normal(ks[9], (FF, H), jnp.float32)
    b2 = jnp.zeros((1, H), jnp.float32)
    return (ln1_w, ln1_b, wq, bq, wk, bk, wv, bv, wproj, bproj,
            ln2_w, ln2_b, w1, b1, w2, b2)


# ----------------------------- main ------------------------------------------
if __name__ == "__main__":
    key = jax.random.PRNGKey(0)
    kx, kp = jax.random.split(key)
    x = jax.random.normal(kx, (B, T, H), jnp.float32)
    params = init_params(kp)

    out = jax.block_until_ready(block_forward(x, params))
    ref = jax.block_until_ready(block_reference(x, params))

    assert out.shape == (B, T, H)
    assert jnp.max(jnp.abs(out - ref)) < 1e-3, "mismatch vs JAX reference"
    print("KERNEL_OK")
</pallas_src>

<mosaic_0001>
module attributes {stable_mosaic.version = 11 : i64} {
  func.func @block_kernel(%arg0: i32, %arg1: memref<16x32xf32, #tpu.memory_space<vmem>>, %arg2: memref<6x32xf32, #tpu.memory_space<vmem>>, %arg3: memref<32x96xf32, #tpu.memory_space<vmem>>, %arg4: memref<1x96xf32, #tpu.memory_space<vmem>>, %arg5: memref<32x32xf32, #tpu.memory_space<vmem>>, %arg6: memref<32x128xf32, #tpu.memory_space<vmem>>, %arg7: memref<1x128xf32, #tpu.memory_space<vmem>>, %arg8: memref<128x32xf32, #tpu.memory_space<vmem>>, %arg9: memref<16x32xf32, #tpu.memory_space<vmem>>) attributes {dimension_semantics = [#tpu.dimension_semantics<arbitrary>], iteration_bounds = array<i64: 1>, scalar_prefetch = 0 : i64, scratch_operands = 0 : i64, tpu.core_type = #tpu.core_type<tc>, window_params = [{pipeline_mode = #tpu.pipeline_mode<synchronous>, transform_indices = @transform_0, window_bounds = array<i64: 16, 32>}, {pipeline_mode = #tpu.pipeline_mode<synchronous>, transform_indices = @transform_1, window_bounds = array<i64: 6, 32>}, {pipeline_mode = #tpu.pipeline_mode<synchronous>, transform_indices = @transform_2, window_bounds = array<i64: 32, 96>}, {pipeline_mode = #tpu.pipeline_mode<synchronous>, transform_indices = @transform_3, window_bounds = array<i64: 1, 96>}, {pipeline_mode = #tpu.pipeline_mode<synchronous>, transform_indices = @transform_4, window_bounds = array<i64: 32, 32>}, {pipeline_mode = #tpu.pipeline_mode<synchronous>, transform_indices = @transform_5, window_bounds = array<i64: 32, 128>}, {pipeline_mode = #tpu.pipeline_mode<synchronous>, transform_indices = @transform_6, window_bounds = array<i64: 1, 128>}, {pipeline_mode = #tpu.pipeline_mode<synchronous>, transform_indices = @transform_7, window_bounds = array<i64: 128, 32>}, {pipeline_mode = #tpu.pipeline_mode<synchronous>, transform_indices = @transform_8, window_bounds = array<i64: 16, 32>}]} {
    %c0 = arith.constant 0 : index
    %c0_0 = arith.constant 0 : index
    %0 = vector.load %arg1[%c0, %c0_0] : memref<16x32xf32, #tpu.memory_space<vmem>>, vector<16x32xf32>
    %c0_1 = arith.constant 0 : index
    %c0_2 = arith.constant 0 : index
    %1 = vector.load %arg2[%c0_1, %c0_2] : memref<6x32xf32, #tpu.memory_space<vmem>>, vector<6x32xf32>
    %2 = vector.extract_strided_slice %1 {offsets = [0, 0], sizes = [1, 32], strides = [1, 1]} : vector<6x32xf32> to vector<1x32xf32>
    %3 = vector.extract_strided_slice %1 {offsets = [1, 0], sizes = [1, 32], strides = [1, 1]} : vector<6x32xf32> to vector<1x32xf32>
    %4 = vector.extract_strided_slice %1 {offsets = [2, 0], sizes = [1, 32], strides = [1, 1]} : vector<6x32xf32> to vector<1x32xf32>
    %5 = vector.extract_strided_slice %1 {offsets = [3, 0], sizes = [1, 32], strides = [1, 1]} : vector<6x32xf32> to vector<1x32xf32>
    %6 = vector.extract_strided_slice %1 {offsets = [4, 0], sizes = [1, 32], strides = [1, 1]} : vector<6x32xf32> to vector<1x32xf32>
    %7 = vector.extract_strided_slice %1 {offsets = [5, 0], sizes = [1, 32], strides = [1, 1]} : vector<6x32xf32> to vector<1x32xf32>
    %cst = arith.constant dense<0.000000e+00> : vector<16xf32>
    %8 = vector.multi_reduction <add>, %0, %cst [1] : vector<16x32xf32> to vector<16xf32>
    %9 = vector.shape_cast %8 : vector<16xf32> to vector<16x1xf32>
    %cst_3 = arith.constant 3.200000e+01 : f32
    %10 = vector.broadcast %cst_3 : f32 to vector<16x1xf32>
    %11 = arith.divf %9, %10 : vector<16x1xf32>
    %12 = vector.broadcast %11 : vector<16x1xf32> to vector<16x32xf32>
    %13 = arith.subf %0, %12 : vector<16x32xf32>
    %14 = arith.mulf %13, %13 : vector<16x32xf32>
    %cst_4 = arith.constant dense<0.000000e+00> : vector<16xf32>
    %15 = vector.multi_reduction <add>, %14, %cst_4 [1] : vector<16x32xf32> to vector<16xf32>
    %16 = vector.shape_cast %15 : vector<16xf32> to vector<16x1xf32>
    %cst_5 = arith.constant 3.200000e+01 : f32
    %17 = vector.broadcast %cst_5 : f32 to vector<16x1xf32>
    %18 = arith.divf %16, %17 : vector<16x1xf32>
    %cst_6 = arith.constant 9.99999974E-6 : f32
    %19 = vector.broadcast %cst_6 : f32 to vector<16x1xf32>
    %20 = arith.addf %18, %19 : vector<16x1xf32>
    %21 = math.rsqrt %20 : vector<16x1xf32>
    %22 = vector.broadcast %21 : vector<16x1xf32> to vector<16x32xf32>
    %23 = arith.mulf %13, %22 : vector<16x32xf32>
    %24 = vector.broadcast %2 : vector<1x32xf32> to vector<16x32xf32>
    %25 = arith.mulf %23, %24 : vector<16x32xf32>
    %26 = vector.broadcast %3 : vector<1x32xf32> to vector<16x32xf32>
    %27 = arith.addf %25, %26 : vector<16x32xf32>
    %c0_7 = arith.constant 0 : index
    %c0_8 = arith.constant 0 : index
    %28 = vector.load %arg3[%c0_7, %c0_8] : memref<32x96xf32, #tpu.memory_space<vmem>>, vector<32x96xf32>
    %cst_9 = arith.constant dense<0.000000e+00> : vector<16x96xf32>
    %29 = tpu.matmul %27, %28, %cst_9 {dimension_numbers = #tpu.dot_dimension_numbers<[1], [0], [0], [1], [0, 0, 1, 1], [], []>} : vector<16x32xf32>, vector<32x96xf32>, vector<16x96xf32> -> vector<16x96xf32>
    %c0_10 = arith.constant 0 : index
    %c0_11 = arith.constant 0 : index
    %30 = vector.load %arg4[%c0_10, %c0_11] : memref<1x96xf32, #tpu.memory_space<vmem>>, vector<1x96xf32>
    %31 = vector.broadcast %30 : vector<1x96xf32> to vector<16x96xf32>
    %32 = arith.addf %29, %31 : vector<16x96xf32>
    %33 = vector.extract_strided_slice %32 {offsets = [0, 0], sizes = [16, 32], strides = [1, 1]} : vector<16x96xf32> to vector<16x32xf32>
    %34 = vector.shape_cast %33 : vector<16x32xf32> to vector<2x8x32xf32>
    %35 = vector.extract_strided_slice %32 {offsets = [0, 32], sizes = [16, 32], strides = [1, 1]} : vector<16x96xf32> to vector<16x32xf32>
    %36 = vector.shape_cast %35 : vector<16x32xf32> to vector<2x8x32xf32>
    %37 = vector.extract_strided_slice %32 {offsets = [0, 64], sizes = [16, 32], strides = [1, 1]} : vector<16x96xf32> to vector<16x32xf32>
    %38 = vector.shape_cast %37 : vector<16x32xf32> to vector<2x8x32xf32>
    %39 = tpu.iota {dimensions = array<i32: 0>} : vector<8x8xi32>
    %40 = tpu.iota {dimensions = array<i32: 1>} : vector<8x8xi32>
    %41 = arith.cmpi sge, %39, %40 : vector<8x8xi32>
    %42 = vector.shape_cast %41 : vector<8x8xi1> to vector<1x8x8xi1>
    %cst_12 = arith.constant 0.000000e+00 : f32
    %43 = vector.broadcast %cst_12 : f32 to vector<16x32xf32>
    %44 = vector.extract_strided_slice %34 {offsets = [0, 0, 0], sizes = [2, 8, 8], strides = [1, 1, 1]} : vector<2x8x32xf32> to vector<2x8x8xf32>
    %45 = vector.extract_strided_slice %36 {offsets = [0, 0, 0], sizes = [2, 8, 8], strides = [1, 1, 1]} : vector<2x8x32xf32> to vector<2x8x8xf32>
    %46 = vector.extract_strided_slice %38 {offsets = [0, 0, 0], sizes = [2, 8, 8], strides = [1, 1, 1]} : vector<2x8x32xf32> to vector<2x8x8xf32>
    "tpu.trace_start"() <{level = 10 : i32, message = "bqd,bkd->bqk"}> : () -> ()
    %cst_13 = arith.constant dense<0.000000e+00> : vector<2x8x8xf32>
    %47 = tpu.matmul %44, %45, %cst_13 {dimension_numbers = #tpu.dot_dimension_numbers<[2], [2], [1], [1], [0, 0, 0, 1, 1, 1], [0], [0]>} : vector<2x8x8xf32>, vector<2x8x8xf32>, vector<2x8x8xf32> -> vector<2x8x8xf32>
    %cst_14 = arith.constant -1.000000e+30 : f32
    "tpu.trace_stop"() : () -> ()
    %48 = vector.shape_cast %42 : vector<1x8x8xi1> to vector<1x8x8xi1>
    %49 = vector.broadcast %48 : vector<1x8x8xi1> to vector<2x8x8xi1>
    %50 = vector.broadcast %cst_14 : f32 to vector<2x8x8xf32>
    %51 = arith.select %49, %47, %50 : vector<2x8x8xi1>, vector<2x8x8xf32>
    %cst_15 = arith.constant dense<0xFF800000> : vector<2x8xf32>
    %52 = vector.multi_reduction <maximumf>, %51, %cst_15 [2] : vector<2x8x8xf32> to vector<2x8xf32>
    %53 = vector.shape_cast %52 : vector<2x8xf32> to vector<2x8x1xf32>
    %54 = vector.broadcast %53 : vector<2x8x1xf32> to vector<2x8x8xf32>
    %55 = arith.subf %51, %54 : vector<2x8x8xf32>
    %56 = math.exp %55 : vector<2x8x8xf32>
    %cst_16 = arith.constant dense<0.000000e+00> : vector<2x8xf32>
    %57 = vector.multi_reduction <add>, %56, %cst_16 [2] : vector<2x8x8xf32> to vector<2x8xf32>
    %58 = vector.shape_cast %57 : vector<2x8xf32> to vector<2x8x1xf32>
    %59 = tpu.reciprocal %58 : vector<2x8x1xf32> -> vector<2x8x1xf32>
    %60 = vector.broadcast %59 : vector<2x8x1xf32> to vector<2x8x8xf32>
    %61 = arith.mulf %56, %60 : vector<2x8x8xf32>
    "tpu.trace_start"() <{level = 10 : i32, message = "bqk,bkd->bqd"}> : () -> ()
    %cst_17 = arith.constant dense<0.000000e+00> : vector<2x8x8xf32>
    %62 = tpu.matmul %61, %46, %cst_17 {dimension_numbers = #tpu.dot_dimension_numbers<[2], [1], [1], [2], [0, 0, 0, 1, 1, 2], [0], [0]>} : vector<2x8x8xf32>, vector<2x8x8xf32>, vector<2x8x8xf32> -> vector<2x8x8xf32>
    "tpu.trace_stop"() : () -> ()
    %63 = vector.shape_cast %62 : vector<2x8x8xf32> to vector<16x8xf32>
    %c0_18 = arith.constant 0 : index
    %c0_19 = arith.constant 0 : index
    %64 = vector.load %arg5[%c0_18, %c0_19] : memref<32x32xf32, #tpu.memory_space<vmem>>, vector<8x32xf32>
    %cst_20 = arith.constant dense<0.000000e+00> : vector<16x32xf32>
    %65 = tpu.matmul %63, %64, %cst_20 {dimension_numbers = #tpu.dot_dimension_numbers<[1], [0], [0], [1], [0, 0, 1, 1], [], []>} : vector<16x8xf32>, vector<8x32xf32>, vector<16x32xf32> -> vector<16x32xf32>
    %66 = arith.addf %43, %65 : vector<16x32xf32>
    %67 = vector.extract_strided_slice %34 {offsets = [0, 0, 8], sizes = [2, 8, 8], strides = [1, 1, 1]} : vector<2x8x32xf32> to vector<2x8x8xf32>
    %68 = vector.extract_strided_slice %36 {offsets = [0, 0, 8], sizes = [2, 8, 8], strides = [1, 1, 1]} : vector<2x8x32xf32> to vector<2x8x8xf32>
    %69 = vector.extract_strided_slice %38 {offsets = [0, 0, 8], sizes = [2, 8, 8], strides = [1, 1, 1]} : vector<2x8x32xf32> to vector<2x8x8xf32>
    "tpu.trace_start"() <{level = 10 : i32, message = "bqd,bkd->bqk"}> : () -> ()
    %cst_21 = arith.constant dense<0.000000e+00> : vector<2x8x8xf32>
    %70 = tpu.matmul %67, %68, %cst_21 {dimension_numbers = #tpu.dot_dimension_numbers<[2], [2], [1], [1], [0, 0, 0, 1, 1, 1], [0], [0]>} : vector<2x8x8xf32>, vector<2x8x8xf32>, vector<2x8x8xf32> -> vector<2x8x8xf32>
    %cst_22 = arith.constant -1.000000e+30 : f32
    "tpu.trace_stop"() : () -> ()
    %71 = vector.shape_cast %42 : vector<1x8x8xi1> to vector<1x8x8xi1>
    %72 = vector.broadcast %71 : vector<1x8x8xi1> to vector<2x8x8xi1>
    %73 = vector.broadcast %cst_22 : f32 to vector<2x8x8xf32>
    %74 = arith.select %72, %70, %73 : vector<2x8x8xi1>, vector<2x8x8xf32>
    %cst_23 = arith.constant dense<0xFF800000> : vector<2x8xf32>
    %75 = vector.multi_reduction <maximumf>, %74, %cst_23 [2] : vector<2x8x8xf32> to vector<2x8xf32>
    %76 = vector.shape_cast %75 : vector<2x8xf32> to vector<2x8x1xf32>
    %77 = vector.broadcast %76 : vector<2x8x1xf32> to vector<2x8x8xf32>
    %78 = arith.subf %74, %77 : vector<2x8x8xf32>
    %79 = math.exp %78 : vector<2x8x8xf32>
    %cst_24 = arith.constant dense<0.000000e+00> : vector<2x8xf32>
    %80 = vector.multi_reduction <add>, %79, %cst_24 [2] : vector<2x8x8xf32> to vector<2x8xf32>
    %81 = vector.shape_cast %80 : vector<2x8xf32> to vector<2x8x1xf32>
    %82 = tpu.reciprocal %81 : vector<2x8x1xf32> -> vector<2x8x1xf32>
    %83 = vector.broadcast %82 : vector<2x8x1xf32> to vector<2x8x8xf32>
    %84 = arith.mulf %79, %83 : vector<2x8x8xf32>
    "tpu.trace_start"() <{level = 10 : i32, message = "bqk,bkd->bqd"}> : () -> ()
    %cst_25 = arith.constant dense<0.000000e+00> : vector<2x8x8xf32>
    %85 = tpu.matmul %84, %69, %cst_25 {dimension_numbers = #tpu.dot_dimension_numbers<[2], [1], [1], [2], [0, 0, 0, 1, 1, 2], [0], [0]>} : vector<2x8x8xf32>, vector<2x8x8xf32>, vector<2x8x8xf32> -> vector<2x8x8xf32>
    "tpu.trace_stop"() : () -> ()
    %86 = vector.shape_cast %85 : vector<2x8x8xf32> to vector<16x8xf32>
    %c8 = arith.constant 8 : index
    %c0_26 = arith.constant 0 : index
    %87 = vector.load %arg5[%c8, %c0_26] : memref<32x32xf32, #tpu.memory_space<vmem>>, vector<8x32xf32>
    %cst_27 = arith.constant dense<0.000000e+00> : vector<16x32xf32>
    %88 = tpu.matmul %86, %87, %cst_27 {dimension_numbers = #tpu.dot_dimension_numbers<[1], [0], [0], [1], [0, 0, 1, 1], [], []>} : vector<16x8xf32>, vector<8x32xf32>, vector<16x32xf32> -> vector<16x32xf32>
    %89 = arith.addf %66, %88 : vector<16x32xf32>
    %90 = vector.extract_strided_slice %34 {offsets = [0, 0, 16], sizes = [2, 8, 8], strides = [1, 1, 1]} : vector<2x8x32xf32> to vector<2x8x8xf32>
    %91 = vector.extract_strided_slice %36 {offsets = [0, 0, 16], sizes = [2, 8, 8], strides = [1, 1, 1]} : vector<2x8x32xf32> to vector<2x8x8xf32>
    %92 = vector.extract_strided_slice %38 {offsets = [0, 0, 16], sizes = [2, 8, 8], strides = [1, 1, 1]} : vector<2x8x32xf32> to vector<2x8x8xf32>
    "tpu.trace_start"() <{level = 10 : i32, message = "bqd,bkd->bqk"}> : () -> ()
    %cst_28 = arith.constant dense<0.000000e+00> : vector<2x8x8xf32>
    %93 = tpu.matmul %90, %91, %cst_28 {dimension_numbers = #tpu.dot_dimension_numbers<[2], [2], [1], [1], [0, 0, 0, 1, 1, 1], [0], [0]>} : vector<2x8x8xf32>, vector<2x8x8xf32>, vector<2x8x8xf32> -> vector<2x8x8xf32>
    %cst_29 = arith.constant -1.000000e+30 : f32
    "tpu.trace_stop"() : () -> ()
    %94 = vector.shape_cast %42 : vector<1x8x8xi1> to vector<1x8x8xi1>
    %95 = vector.broadcast %94 : vector<1x8x8xi1> to vector<2x8x8xi1>
    %96 = vector.broadcast %cst_29 : f32 to vector<2x8x8xf32>
    %97 = arith.select %95, %93, %96 : vector<2x8x8xi1>, vector<2x8x8xf32>
    %cst_30 = arith.constant dense<0xFF800000> : vector<2x8xf32>
    %98 = vector.multi_reduction <maximumf>, %97, %cst_30 [2] : vector<2x8x8xf32> to vector<2x8xf32>
    %99 = vector.shape_cast %98 : vector<2x8xf32> to vector<2x8x1xf32>
    %100 = vector.broadcast %99 : vector<2x8x1xf32> to vector<2x8x8xf32>
    %101 = arith.subf %97, %100 : vector<2x8x8xf32>
    %102 = math.exp %101 : vector<2x8x8xf32>
    %cst_31 = arith.constant dense<0.000000e+00> : vector<2x8xf32>
    %103 = vector.multi_reduction <add>, %102, %cst_31 [2] : vector<2x8x8xf32> to vector<2x8xf32>
    %104 = vector.shape_cast %103 : vector<2x8xf32> to vector<2x8x1xf32>
    %105 = tpu.reciprocal %104 : vector<2x8x1xf32> -> vector<2x8x1xf32>
    %106 = vector.broadcast %105 : vector<2x8x1xf32> to vector<2x8x8xf32>
    %107 = arith.mulf %102, %106 : vector<2x8x8xf32>
    "tpu.trace_start"() <{level = 10 : i32, message = "bqk,bkd->bqd"}> : () -> ()
    %cst_32 = arith.constant dense<0.000000e+00> : vector<2x8x8xf32>
    %108 = tpu.matmul %107, %92, %cst_32 {dimension_numbers = #tpu.dot_dimension_numbers<[2], [1], [1], [2], [0, 0, 0, 1, 1, 2], [0], [0]>} : vector<2x8x8xf32>, vector<2x8x8xf32>, vector<2x8x8xf32> -> vector<2x8x8xf32>
    "tpu.trace_stop"() : () -> ()
    %109 = vector.shape_cast %108 : vector<2x8x8xf32> to vector<16x8xf32>
    %c16 = arith.constant 16 : index
    %c0_33 = arith.constant 0 : index
    %110 = vector.load %arg5[%c16, %c0_33] : memref<32x32xf32, #tpu.memory_space<vmem>>, vector<8x32xf32>
    %cst_34 = arith.constant dense<0.000000e+00> : vector<16x32xf32>
    %111 = tpu.matmul %109, %110, %cst_34 {dimension_numbers = #tpu.dot_dimension_numbers<[1], [0], [0], [1], [0, 0, 1, 1], [], []>} : vector<16x8xf32>, vector<8x32xf32>, vector<16x32xf32> -> vector<16x32xf32>
    %112 = arith.addf %89, %111 : vector<16x32xf32>
    %113 = vector.extract_strided_slice %34 {offsets = [0, 0, 24], sizes = [2, 8, 8], strides = [1, 1, 1]} : vector<2x8x32xf32> to vector<2x8x8xf32>
    %114 = vector.extract_strided_slice %36 {offsets = [0, 0, 24], sizes = [2, 8, 8], strides = [1, 1, 1]} : vector<2x8x32xf32> to vector<2x8x8xf32>
    %115 = vector.extract_strided_slice %38 {offsets = [0, 0, 24], sizes = [2, 8, 8], strides = [1, 1, 1]} : vector<2x8x32xf32> to vector<2x8x8xf32>
    "tpu.trace_start"() <{level = 10 : i32, message = "bqd,bkd->bqk"}> : () -> ()
    %cst_35 = arith.constant dense<0.000000e+00> : vector<2x8x8xf32>
    %116 = tpu.matmul %113, %114, %cst_35 {dimension_numbers = #tpu.dot_dimension_numbers<[2], [2], [1], [1], [0, 0, 0, 1, 1, 1], [0], [0]>} : vector<2x8x8xf32>, vector<2x8x8xf32>, vector<2x8x8xf32> -> vector<2x8x8xf32>
    %cst_36 = arith.constant -1.000000e+30 : f32
    "tpu.trace_stop"() : () -> ()
    %117 = vector.shape_cast %42 : vector<1x8x8xi1> to vector<1x8x8xi1>
    %118 = vector.broadcast %117 : vector<1x8x8xi1> to vector<2x8x8xi1>
    %119 = vector.broadcast %cst_36 : f32 to vector<2x8x8xf32>
    %120 = arith.select %118, %116, %119 : vector<2x8x8xi1>, vector<2x8x8xf32>
    %cst_37 = arith.constant dense<0xFF800000> : vector<2x8xf32>
    %121 = vector.multi_reduction <maximumf>, %120, %cst_37 [2] : vector<2x8x8xf32> to vector<2x8xf32>
    %122 = vector.shape_cast %121 : vector<2x8xf32> to vector<2x8x1xf32>
    %123 = vector.broadcast %122 : vector<2x8x1xf32> to vector<2x8x8xf32>
    %124 = arith.subf %120, %123 : vector<2x8x8xf32>
    %125 = math.exp %124 : vector<2x8x8xf32>
    %cst_38 = arith.constant dense<0.000000e+00> : vector<2x8xf32>
    %126 = vector.multi_reduction <add>, %125, %cst_38 [2] : vector<2x8x8xf32> to vector<2x8xf32>
    %127 = vector.shape_cast %126 : vector<2x8xf32> to vector<2x8x1xf32>
    %128 = tpu.reciprocal %127 : vector<2x8x1xf32> -> vector<2x8x1xf32>
    %129 = vector.broadcast %128 : vector<2x8x1xf32> to vector<2x8x8xf32>
    %130 = arith.mulf %125, %129 : vector<2x8x8xf32>
    "tpu.trace_start"() <{level = 10 : i32, message = "bqk,bkd->bqd"}> : () -> ()
    %cst_39 = arith.constant dense<0.000000e+00> : vector<2x8x8xf32>
    %131 = tpu.matmul %130, %115, %cst_39 {dimension_numbers = #tpu.dot_dimension_numbers<[2], [1], [1], [2], [0, 0, 0, 1, 1, 2], [0], [0]>} : vector<2x8x8xf32>, vector<2x8x8xf32>, vector<2x8x8xf32> -> vector<2x8x8xf32>
    "tpu.trace_stop"() : () -> ()
    %132 = vector.shape_cast %131 : vector<2x8x8xf32> to vector<16x8xf32>
    %c24 = arith.constant 24 : index
    %c0_40 = arith.constant 0 : index
    %133 = vector.load %arg5[%c24, %c0_40] : memref<32x32xf32, #tpu.memory_space<vmem>>, vector<8x32xf32>
    %cst_41 = arith.constant dense<0.000000e+00> : vector<16x32xf32>
    %134 = tpu.matmul %132, %133, %cst_41 {dimension_numbers = #tpu.dot_dimension_numbers<[1], [0], [0], [1], [0, 0, 1, 1], [], []>} : vector<16x8xf32>, vector<8x32xf32>, vector<16x32xf32> -> vector<16x32xf32>
    %135 = arith.addf %112, %134 : vector<16x32xf32>
    %cst_42 = arith.constant 0.176776692 : f32
    %136 = vector.broadcast %cst_42 : f32 to vector<16x32xf32>
    %137 = arith.mulf %135, %136 : vector<16x32xf32>
    %138 = arith.addf %0, %137 : vector<16x32xf32>
    %139 = vector.broadcast %6 : vector<1x32xf32> to vector<16x32xf32>
    %140 = arith.addf %138, %139 : vector<16x32xf32>
    %cst_43 = arith.constant dense<0.000000e+00> : vector<16xf32>
    %141 = vector.multi_reduction <add>, %140, %cst_43 [1] : vector<16x32xf32> to vector<16xf32>
    %142 = vector.shape_cast %141 : vector<16xf32> to vector<16x1xf32>
    %cst_44 = arith.constant 3.200000e+01 : f32
    %143 = vector.broadcast %cst_44 : f32 to vector<16x1xf32>
    %144 = arith.divf %142, %143 : vector<16x1xf32>
    %145 = vector.broadcast %144 : vector<16x1xf32> to vector<16x32xf32>
    %146 = arith.subf %140, %145 : vector<16x32xf32>
    %147 = arith.mulf %146, %146 : vector<16x32xf32>
    %cst_45 = arith.constant dense<0.000000e+00> : vector<16xf32>
    %148 = vector.multi_reduction <add>, %147, %cst_45 [1] : vector<16x32xf32> to vector<16xf32>
    %149 = vector.shape_cast %148 : vector<16xf32> to vector<16x1xf32>
    %cst_46 = arith.constant 3.200000e+01 : f32
    %150 = vector.broadcast %cst_46 : f32 to vector<16x1xf32>
    %151 = arith.divf %149, %150 : vector<16x1xf32>
    %cst_47 = arith.constant 9.99999974E-6 : f32
    %152 = vector.broadcast %cst_47 : f32 to vector<16x1xf32>
    %153 = arith.addf %151, %152 : vector<16x1xf32>
    %154 = math.rsqrt %153 : vector<16x1xf32>
    %155 = vector.broadcast %154 : vector<16x1xf32> to vector<16x32xf32>
    %156 = arith.mulf %146, %155 : vector<16x32xf32>
    %157 = vector.broadcast %4 : vector<1x32xf32> to vector<16x32xf32>
    %158 = arith.mulf %156, %157 : vector<16x32xf32>
    %159 = vector.broadcast %5 : vector<1x32xf32> to vector<16x32xf32>
    %160 = arith.addf %158, %159 : vector<16x32xf32>
    %c0_48 = arith.constant 0 : index
    %c0_49 = arith.constant 0 : index
    %161 = vector.load %arg6[%c0_48, %c0_49] : memref<32x128xf32, #tpu.memory_space<vmem>>, vector<32x128xf32>
    %cst_50 = arith.constant dense<0.000000e+00> : vector<16x128xf32>
    %162 = tpu.matmul %160, %161, %cst_50 {dimension_numbers = #tpu.dot_dimension_numbers<[1], [0], [0], [1], [0, 0, 1, 1], [], []>} : vector<16x32xf32>, vector<32x128xf32>, vector<16x128xf32> -> vector<16x128xf32>
    %c0_51 = arith.constant 0 : index
    %c0_52 = arith.constant 0 : index
    %163 = vector.load %arg7[%c0_51, %c0_52] : memref<1x128xf32, #tpu.memory_space<vmem>>, vector<1x128xf32>
    %164 = vector.broadcast %163 : vector<1x128xf32> to vector<16x128xf32>
    %165 = arith.addf %162, %164 : vector<16x128xf32>
    %cst_53 = arith.constant 5.000000e-01 : f32
    %166 = vector.broadcast %cst_53 : f32 to vector<16x128xf32>
    %167 = arith.mulf %166, %165 : vector<16x128xf32>
    %cst_54 = arith.constant 0.707106769 : f32
    %168 = vector.broadcast %cst_54 : f32 to vector<16x128xf32>
    %169 = arith.mulf %165, %168 : vector<16x128xf32>
    %170 = math.erf %169 : vector<16x128xf32>
    %cst_55 = arith.constant 1.000000e+00 : f32
    %171 = vector.broadcast %cst_55 : f32 to vector<16x128xf32>
    %172 = arith.addf %171, %170 : vector<16x128xf32>
    %173 = arith.mulf %167, %172 : vector<16x128xf32>
    %c0_56 = arith.constant 0 : index
    %c0_57 = arith.constant 0 : index
    %174 = vector.load %arg8[%c0_56, %c0_57] : memref<128x32xf32, #tpu.memory_space<vmem>>, vector<128x32xf32>
    %cst_58 = arith.constant dense<0.000000e+00> : vector<16x32xf32>
    %175 = tpu.matmul %173, %174, %cst_58 {dimension_numbers = #tpu.dot_dimension_numbers<[1], [0], [0], [1], [0, 0, 1, 1], [], []>} : vector<16x128xf32>, vector<128x32xf32>, vector<16x32xf32> -> vector<16x32xf32>
    %176 = vector.broadcast %7 : vector<1x32xf32> to vector<16x32xf32>
    %177 = arith.addf %175, %176 : vector<16x32xf32>
    %178 = arith.addf %140, %177 : vector<16x32xf32>
    %c0_59 = arith.constant 0 : index
    %c0_60 = arith.constant 0 : index
    %179 = vector.load %arg9[%c0_59, %c0_60] : memref<16x32xf32, #tpu.memory_space<vmem>>, vector<16x32xf32>
    tpu.vector_store %arg9[%c0_59, %c0_60], %178 {strides = array<i32>} : memref<16x32xf32, #tpu.memory_space<vmem>>, vector<16x32xf32>,
    return
  }
  func.func @transform_0(%arg0: i32) -> (i32, i32) {
    %c0_i32 = arith.constant 0 : i32
    %c0_i32_0 = arith.constant 0 : i32
    %c0_i32_1 = arith.constant 0 : i32
    return %c0_i32, %c0_i32_0 : i32, i32
  }
  func.func @transform_1(%arg0: i32) -> (i32, i32) {
    %c0_i32 = arith.constant 0 : i32
    %c0_i32_0 = arith.constant 0 : i32
    %c0_i32_1 = arith.constant 0 : i32
    return %c0_i32, %c0_i32_0 : i32, i32
  }
  func.func @transform_2(%arg0: i32) -> (i32, i32) {
    %c0_i32 = arith.constant 0 : i32
    %c0_i32_0 = arith.constant 0 : i32
    %c0_i32_1 = arith.constant 0 : i32
    return %c0_i32, %c0_i32_0 : i32, i32
  }
  func.func @transform_3(%arg0: i32) -> (i32, i32) {
    %c0_i32 = arith.constant 0 : i32
    %c0_i32_0 = arith.constant 0 : i32
    %c0_i32_1 = arith.constant 0 : i32
    return %c0_i32, %c0_i32_0 : i32, i32
  }
  func.func @transform_4(%arg0: i32) -> (i32, i32) {
    %c0_i32 = arith.constant 0 : i32
    %c0_i32_0 = arith.constant 0 : i32
    %c0_i32_1 = arith.constant 0 : i32
    return %c0_i32, %c0_i32_0 : i32, i32
  }
  func.func @transform_5(%arg0: i32) -> (i32, i32) {
    %c0_i32 = arith.constant 0 : i32
    %c0_i32_0 = arith.constant 0 : i32
    %c0_i32_1 = arith.constant 0 : i32
    return %c0_i32, %c0_i32_0 : i32, i32
  }
  func.func @transform_6(%arg0: i32) -> (i32, i32) {
    %c0_i32 = arith.constant 0 : i32
    %c0_i32_0 = arith.constant 0 : i32
    %c0_i32_1 = arith.constant 0 : i32
    return %c0_i32, %c0_i32_0 : i32, i32
  }
  func.func @transform_7(%arg0: i32) -> (i32, i32) {
    %c0_i32 = arith.constant 0 : i32
    %c0_i32_0 = arith.constant 0 : i32
    %c0_i32_1 = arith.constant 0 : i32
    return %c0_i32, %c0_i32_0 : i32, i32
  }
  func.func @transform_8(%arg0: i32) -> (i32, i32) {
    %c0_i32 = arith.constant 0 : i32
    %c0_i32_0 = arith.constant 0 : i32
    %c0_i32_1 = arith.constant 0 : i32
    return %c0_i32, %c0_i32_0 : i32, i32
  }
}

</mosaic_0001>

<bundles_post_ra>
// kernel: tpu_custom_call.1
= control target key start
LH: loop header
LB: loop body
LE: loop exit
PB: predicated region body
PF: predicated region fallthrough
CT: control target
= control target key end

     0   :  { %vm33_vm0 = vcmask 261120   ;;  %s1611_s0 = inlined_call_operand.vmem [shape: f32[16,32], index: 0, kind: input, shape index: {}]   ;;  %s1612_s1 = inlined_call_operand.vmem [shape: f32[6,32], index: 1, kind: input, shape index: {}]   ;;  %s1613_s2 = inlined_call_operand.vmem [shape: f32[32,96], index: 2, kind: input, shape index: {}]   ;;  %s1614_s3 = inlined_call_operand.vmem [shape: f32[1,96], index: 3, kind: input, shape index: {}]   ;;  %s1615_s4 = inlined_call_operand.vmem [shape: f32[32,32], index: 4, kind: input, shape index: {}]   ;;  %s1616_s5 = inlined_call_operand.vmem [shape: f32[32,128], index: 5, kind: input, shape index: {}]   ;;  %s1617_s6 = inlined_call_operand.vmem [shape: f32[1,128], index: 6, kind: input, shape index: {}]   ;;  %s1618_s7 = inlined_call_operand.vmem [shape: f32[128,32], index: 7, kind: input, shape index: {}]   ;;  %s1619_s8 = inlined_call_operand.hbm [shape: f32[16,32], index: 8, kind: output, shape index: {}]  }
   0x1   :  { %v1325_v0 = vld [vmem:[%s1611_s0] sm:$0xff] }
   0x2   :  { %v34_v1 = vsel %vm33_vm0, %v1325_v0, 0.0 }
   0x3   :  { %13 = vsyncpa [#allocation3], 0  ;;  %35 = vadd.xlane.f32.xlu0 %v34_v1  ;;  %v1332_v2 = vld [vmem:[%s1611_s0 + $0x8] sm:$0xff]  ;;  %v1262_v4 = vmov 32.0   ;;  %v94_v21 = vld [vmem:[%s1613_s2 + $0x18] sm:$0xff]  ;;  %s1263_s19 = smov 88  }
   0x4   :  { %v37_v3 = vsel %vm33_vm0, %v1332_v2, 0.0  ;;  %1189 = vrcp.f32 %v1262_v4  ;;  %117 = vmatpush.msra.mxu0 %v94_v21  ;;  %v93_v22 = vld [vmem:[%s1613_s2 + $0x10] sm:$0xff]  ;;  %v92_v23 = vld [vmem:[%s1613_s2 + $0x8] sm:$0xff]  ;;  %v91_v24 = vld [vmem:[%s1613_s2] sm:$0xff]  ;;  %s1264_s20 = smov 96   ;;  %s1265_s21 = smov 120  }
   0x5   :  { %v1361_v36 = vld [vmem:[%s1612_s1] sm:$0x3f]  ;;  %vm136_vm8 = vcmask 64512   ;;  %s1267_s22 = smov 112   ;;  %s1268_s23 = smov 56  }
   0x6   :  { %118 = vmatpush.msra.mxu0 %v93_v22  ;;  %v85_v40 = vperm.slane %v1361_v36, 0  ;;  %v88_v44 = vperm.slane %v1361_v36, 1  ;;  %v1187_v54 = vld [vmem:[%s1614_s3] ss:$0 sm:$0xff]  ;;  %s1266_s3 = smov 64   ;;  %s1269_s24 = smov 80  }
   0x7   :  { %s1270_s25 = smov 72   ;;  %s1271_s30 = smov 48  }
   0x8   :  { %119 = vmatpush.msra.mxu0 %v92_v23  ;;  %s1272_s0 = smov 104   ;;  %s1273_s11 = smov 40  }
   0x9   :  { %s1122_s29 = sshll.u32 %s1619_s8, 4  ;;  %s1123_s29 = int_to_ptr.hbm [resolvable:$true] %s1122_s29 }
   0xa   :  { %v1190_v5 = vpop.eup %1189  ;;  %120 = vmatpush.msra.mxu0 %v91_v24 }
   0xb   :  { %38 = vadd.xlane.f32.xlu0 %v37_v3  ;;  %v41_v6 = vmul.f32 32.0, %v1190_v5  ;;  %vm45_vm1 = vweird.f32 %v1190_v5  ;;  %v128_v3 = vlaneseq }
   0xd   :  { %v42_v7 = vsub.f32 1.0, %v41_v6  ;;  %v129_v4 = vshrl.u32 %v128_v3, 7 }
   0xf   :  { %v43_v8 = vmul.f32 %v1190_v5, %v42_v7 }
  0x11   :  { %v44_v9 = vadd.f32 %v1190_v5, %v43_v8 }
  0x13   :  { %v1336_v10 = vsel %vm45_vm1, %v1190_v5, %v44_v9  ;;  %v131_v5 = vand.u32 127, %v128_v3 }
  0x15   :  { %vm1390_vm9 = vcmp.ge.s32.totalorder %v129_v4, %v131_v5 }
  0x76   :  { %v36_v11 = vpop.xlane.xlu0 %35 }
  0x77   :  { %v47_v12 = vmul.f32 %v1336_v10, %v36_v11 }
  0x79   :  { %v49_v13 = vsub.f32 %v1325_v0, %v47_v12 }
  0x7b   :  { %v51_v14 = vmul.f32 %v49_v13, %v49_v13 }
  0x7d   :  { %v53_v15 = vsel %vm33_vm0, %v51_v14, 0.0 }
  0x7e   :  { %54 = vadd.xlane.f32.xlu1 %v53_v15  ;;  %v39_v16 = vpop.xlane.xlu0 %38 }
  0x7f   :  { %v48_v17 = vmul.f32 %v1336_v10, %v39_v16 }
  0x81   :  { %v50_v18 = vsub.f32 %v1332_v2, %v48_v17 }
  0x83   :  { %v52_v19 = vmul.f32 %v50_v18, %v50_v18 }
  0x85   :  { %v56_v20 = vsel %vm33_vm0, %v52_v19, 0.0 }
  0x86   :  { %57 = vadd.xlane.f32.xlu1 %v56_v20 }
  0xf1   :  { %v55_v25 = vpop.xlane.xlu1 %54 }
  0xf2   :  { %v59_v26 = vmul.f32 %v55_v25, %v1336_v10 }
  0xf4   :  { %v61_v27 = vadd.f32 1e-05, %v59_v26 }
  0xf6   :  { %1191 = vrsqrt.f32 %v61_v27  ;;  %vm69_vm3 = vweird.f32 %v61_v27 }
  0xf9   :  { %v58_v28 = vpop.xlane.xlu1 %57 }
  0xfa   :  { %v60_v29 = vmul.f32 %v58_v28, %v1336_v10 }
  0xfc   :  { %v1192_v30 = vpop.eup %1191  ;;  %v62_v31 = vadd.f32 1e-05, %v60_v29 }
  0xfd   :  { %v64_v32 = vmul.f32 %v1192_v30, %v61_v27  ;;  %vm70_vm2 = vweird.f32 %v1192_v30 }
  0xfe   :  { %1193 = vrsqrt.f32 %v62_v31  ;;  %vm71_vm4 = vmor %vm69_vm3, %vm70_vm2  ;;  %vm79_vm6 = vweird.f32 %v62_v31 }
  0xff   :  { %v65_v33 = vmul.f32 %v1192_v30, %v64_v32 }
 0x101   :  { %v66_v34 = vmul.f32 0.5, %v65_v33 }
 0x103   :  { %v67_v35 = vsub.f32 1.5, %v66_v34 }
 0x104   :  { %v1194_v37 = vpop.eup %1193 }
 0x105   :  { %v68_v38 = vmul.f32 %v1192_v30, %v67_v35  ;;  %v74_v39 = vmul.f32 %v1194_v37, %v62_v31  ;;  %vm80_vm5 = vweird.f32 %v1194_v37 }
 0x106   :  { %vm81_vm7 = vmor %vm79_vm6, %vm80_vm5 }
 0x107   :  { %v72_v41 = vsel %vm71_vm4, %v1192_v30, %v68_v38  ;;  %v75_v42 = vmul.f32 %v1194_v37, %v74_v39 }
 0x108   :  { %v83_v43 = vmul.f32 %v72_v41, %v49_v13 }
 0x109   :  { %v76_v45 = vmul.f32 0.5, %v75_v42 }
 0x10a   :  { %v86_v46 = vmul.f32 %v85_v40, %v83_v43 }
 0x10b   :  { %v77_v47 = vsub.f32 1.5, %v76_v45 }
 0x10c   :  { %v89_v48 = vadd.f32 %v88_v44, %v86_v46 }
 0x10d   :  { %v78_v49 = vmul.f32 %v1194_v37, %v77_v47 }
 0x10e   :  { %1134 = vmatmul.msk.f32.vlgmr.msra.gmra.mxu0 %vm33_vm0, %v89_v48 }
 0x10f   :  { %v82_v50 = vsel %vm81_vm7, %v1194_v37, %v78_v49 }
 0x110   :  { %v84_v51 = vmul.f32 %v82_v50, %v50_v18 }
 0x112   :  { %v87_v52 = vmul.f32 %v85_v40, %v84_v51 }
 0x114   :  { %v90_v53 = vadd.f32 %v88_v44, %v87_v52 }
 0x116   :  { %1135 = vmatmul.msk.f32.gmra.mxu0 %vm33_vm0, %v90_v53 }
 0x18b   :  { %v122_v55 = vpop.f32.mrf.mxu0 }
 0x18c   :  { %v1370_v56 = vadd.f32 %v1187_v54, %v122_v55 }
 0x18e   :  { %295 = vrot.lane.b32.xlu0 %v1370_v56, %s1263_s19  ;;  %134 = vrot.lane.b32.xlu2 %v1370_v56, %s1264_s20 }
 0x18f   :  { %293 = vrot.lane.b32.xlu1 %v1370_v56, %s1265_s21 }
 0x193   :  { %v125_v57 = vpop.f32.mrf.mxu0 }
 0x194   :  { %v1375_v58 = vadd.f32 %v1187_v54, %v125_v57 }
 0x196   :  { %162 = vrot.lane.b32.xlu2 %v1375_v58, %s1264_s20 }
 0x19e   :  { %323 = vrot.lane.b32.xlu2 %v1375_v58, %s1263_s19 }
 0x1a6   :  { %321 = vrot.lane.b32.xlu2 %v1375_v58, %s1265_s21 }
 0x1e8   :  { %v135_v59 = vpop.permute.xlu2 %134 }
 0x1e9   :  { %1136 = vmatpush.xpose.msk.msra.mxu1 %vm136_vm8, %v135_v59 }
 0x1ec   :  { %1137 = vmatmul.msk.f32.vlgmr.msra.gmra.mxu1 %vm136_vm8, %v1370_v56 }
 0x1f0   :  { %v163_v60 = vpop.permute.xlu2 %162 }
 0x1f1   :  { %1138 = vmatpush.xpose.msk.msra.mxu2 %vm136_vm8, %v163_v60 }
 0x1f4   :  { %1139 = vmatmul.msk.f32.vlgmr.msra.gmra.mxu2 %vm136_vm8, %v1375_v58 }
 0x1f8   :  { %v324_v61 = vpop.permute.xlu2 %323 }
 0x1f9   :  { %1144 = vmatpush.xpose.msk.msrb.mxu2 %vm136_vm8, %v324_v61 }
 0x200   :  { %v322_v62 = vpop.permute.xlu2 %321  ;;  %v296_v63 = vpop.permute.xlu0 %295 }
 0x201   :  { %1142 = vmatpush.xpose.msk.msrb.mxu1 %vm136_vm8, %v296_v63  ;;  %1145 = vmatmul.msk.f32.vlgmr.msrb.gmra.mxu2 %vm136_vm8, %v322_v62  ;;  %v294_v1 = vpop.permute.xlu1 %293 }
 0x204   :  { %1143 = vmatmul.msk.f32.vlgmr.msrb.gmra.mxu1 %vm136_vm8, %v294_v1 }
 0x269   :  { %v158_v7 = vpop.f32.mrf.mxu1 }
 0x26a   :  { %v190_v8 = vsel %vm1390_vm9, %v158_v7, -1e+30 }
 0x26b   :  { %v192_v9 = vsel %vm136_vm8, %v190_v8, -inf }
 0x26c   :  { %193 = vmax.xlane.f32.xlu2 %v192_v9 }
 0x277   :  { %v185_v11 = vpop.f32.mrf.mxu2 }
 0x278   :  { %v191_v12 = vsel %vm1390_vm9, %v185_v11, -1e+30 }
 0x279   :  { %v195_v13 = vsel %vm136_vm8, %v191_v12, -inf }
 0x27a   :  { %196 = vmax.xlane.f32.xlu0 %v195_v13 }
 0x281   :  { %v318_v14 = vpop.f32.mrf.mxu1 }
 0x282   :  { %v349_v15 = vsel %vm1390_vm9, %v318_v14, -1e+30 }
 0x283   :  { %v351_v16 = vsel %vm136_vm8, %v349_v15, -inf }
 0x284   :  { %352 = vmax.xlane.f32.xlu1 %v351_v16  ;;  %v346_v37 = vpop.f32.mrf.mxu2 }
 0x285   :  { %v1424_v38 = vsel %vm1390_vm9, %v346_v37, -1e+30 }
 0x286   :  { %v354_v39 = vsel %vm136_vm8, %v1424_v38, -inf }
 0x28e   :  { %266 = vrot.lane.b32.xlu0 %v1375_v58, %s1266_s3 }
 0x29d   :  { %240 = vrot.lane.b32.xlu1 %v1370_v56, %s1266_s3 }
 0x2a5   :  { %510 = vrot.lane.b32.xlu1 %v1370_v56, %s1267_s22 }
 0x2ad   :  { %425 = vrot.lane.b32.xlu1 %v1375_v58, %s1268_s23 }
 0x2df   :  { %v194_v17 = vpop.xlane.xlu2 %193 }
 0x2e0   :  { %v198_v18 = vsub.f32 %v190_v8, %v194_v17 }
 0x2e2   :  { %v200_v19 = vmul.f32 1.442695, %v198_v18 }
 0x2e4   :  { %1195 = vpow2.f32 %v200_v19 }
 0x2ea   :  { %v1196_v20 = vpop.eup %1195 }
 0x2eb   :  { %v204_v21 = vsel %vm136_vm8, %v1196_v20, 0.0 }
 0x2ec   :  { %205 = vadd.xlane.f32.xlu2 %v204_v21 }
 0x2ed   :  { %v197_v22 = vpop.xlane.xlu0 %196 }
 0x2ee   :  { %v199_v23 = vsub.f32 %v191_v12, %v197_v22 }
 0x2f0   :  { %v202_v24 = vmul.f32 1.442695, %v199_v23 }
 0x2f2   :  { %1197 = vpow2.f32 %v202_v24 }
 0x2f7   :  { %v353_v25 = vpop.xlane.xlu1 %352 }
 0x2f8   :  { %v1409_v26 = vpop.eup %1197  ;;  %v357_v27 = vsub.f32 %v349_v15, %v353_v25  ;;  %v451_v25 = vld [vmem:[%s1615_s4 + $0x8] sm:$0xff] }
 0x2f9   :  { %v207_v28 = vsel %vm136_vm8, %v1409_v26, 0.0  ;;  %473 = vmatpush.msrb.mxu0 %v451_v25 }
 0x2fa   :  { %v359_v29 = vmul.f32 1.442695, %v357_v27  ;;  %208 = vadd.xlane.f32.xlu0 %v207_v28 }
 0x2fc   :  { %1199 = vpow2.f32 %v359_v29 }
 0x300   :  { %v267_v33 = vpop.permute.xlu0 %266 }
 0x302   :  { %v1413_v30 = vpop.eup %1199 }
 0x303   :  { %v363_v31 = vsel %vm136_vm8, %v1413_v30, 0.0 }
 0x304   :  { %364 = vadd.xlane.f32.xlu2 %v363_v31 }
 0x30e   :  { %512 = vrot.lane.b32.xlu0 %v1370_v56, %s1269_s24 }
 0x30f   :  { %v241_v32 = vpop.permute.xlu1 %240 }
 0x310   :  { %261 = vmatpush.msra.mxu3 %v241_v32  ;;  %v292_v32 = vld [vmem:[%s1615_s4] sm:$0xff] }
 0x311   :  { %502 = vmatpush.msra.mxu0 %v292_v32 }
 0x312   :  { %287 = vmatpush.msrb.mxu3 %v267_v33 }
 0x317   :  { %v1419_v34 = vpop.permute.xlu1 %510 }
 0x31c   :  { %399 = vrot.lane.b32.xlu2 %v1370_v56, %s1268_s23 }
 0x31f   :  { %v426_v35 = vpop.permute.xlu1 %425 }
 0x320   :  { %446 = vmatpush.msra.mxu1 %v426_v35 }
 0x345   :  { %355 = vmax.xlane.f32.xlu2 %v354_v39 }
 0x35d   :  { %538 = vrot.lane.b32.xlu2 %v1375_v58, %s1267_s22 }
 0x35f   :  { %v206_v40 = vpop.xlane.xlu2 %205 }
 0x360   :  { %1201 = vrcp.f32 %v206_v40  ;;  %v221_v44 = vand.u32 2147483648, %v206_v40  ;;  %v219_v46 = vand.u32 2147483647, %v206_v40  ;;  %vm215_vm11 = vweird.f32 %v206_v40 }
 0x362   :  { %v222_v49 = vor.u32 1.1754944e-38, %v221_v44  ;;  %vm220_vm13 = vcmp.eq.f32.partialorder %v219_v46, 8.507059e+37 }
 0x366   :  { %v1202_v41 = vpop.eup %1201 }
 0x367   :  { %v211_v42 = vmul.f32 %v1202_v41, %v206_v40  ;;  %vm216_vm10 = vweird.f32 %v1202_v41 }
 0x368   :  { %vm217_vm12 = vmor %vm215_vm11, %vm216_vm10 }
 0x369   :  { %v212_v43 = vsub.f32 1.0, %v211_v42 }
 0x36b   :  { %v213_v45 = vmul.f32 %v1202_v41, %v212_v43 }
 0x36d   :  { %v209_v47 = vpop.xlane.xlu0 %208  ;;  %v214_v48 = vadd.f32 %v1202_v41, %v213_v45 }
 0x36e   :  { %1203 = vrcp.f32 %v209_v47  ;;  %v235_v59 = vand.u32 2147483648, %v209_v47  ;;  %v233_v61 = vand.u32 2147483647, %v209_v47  ;;  %vm229_vm15 = vweird.f32 %v209_v47 }
 0x36f   :  { %v218_v50 = vsel %vm217_vm12, %v1202_v41, %v214_v48 }
 0x370   :  { %v223_v51 = vsel %vm220_vm13, %v222_v49, %v218_v50  ;;  %v236_v63 = vor.u32 1.1754944e-38, %v235_v59  ;;  %vm234_vm2 = vcmp.eq.f32.partialorder %v233_v61, 8.507059e+37 }
 0x371   :  { %v238_v52 = vmul.f32 %v1196_v20, %v223_v51 }
 0x373   :  { %1140 = vmatmul.msk.f32.vlgmr.msra.gmra.mxu3 %vm136_vm8, %v238_v52 }
 0x374   :  { %v1204_v53 = vpop.eup %1203 }
 0x375   :  { %v225_v54 = vmul.f32 %v1204_v53, %v209_v47  ;;  %vm230_vm14 = vweird.f32 %v1204_v53 }
 0x376   :  { %vm231_vm1 = vmor %vm229_vm15, %vm230_vm14 }
 0x377   :  { %v226_v55 = vsub.f32 1.0, %v225_v54  ;;  %v365_v57 = vpop.xlane.xlu2 %364 }
 0x378   :  { %1205 = vrcp.f32 %v365_v57  ;;  %v380_v12 = vand.u32 2147483648, %v365_v57  ;;  %v378_v14 = vand.u32 2147483647, %v365_v57  ;;  %vm374_vm4 = vweird.f32 %v365_v57 }
 0x379   :  { %v227_v60 = vmul.f32 %v1204_v53, %v226_v55 }
 0x37a   :  { %v381_v16 = vor.u32 1.1754944e-38, %v380_v12  ;;  %vm379_vm6 = vcmp.eq.f32.partialorder %v378_v14, 8.507059e+37 }
 0x37b   :  { %v228_v62 = vadd.f32 %v1204_v53, %v227_v60 }
 0x37d   :  { %v232_v1 = vsel %vm231_vm1, %v1204_v53, %v228_v62 }
 0x37e   :  { %v1206_v3 = vpop.eup %1205  ;;  %v237_v4 = vsel %vm234_vm2, %v236_v63, %v232_v1 }
 0x37f   :  { %v370_v5 = vmul.f32 %v1206_v3, %v365_v57  ;;  %v400_v7 = vpop.permute.xlu2 %399  ;;  %v239_v8 = vmul.f32 %v1409_v26, %v237_v4  ;;  %vm375_vm3 = vweird.f32 %v1206_v3 }
 0x380   :  { %420 = vmatpush.msra.mxu3 %v400_v7  ;;  %v513_v9 = vpop.permute.xlu0 %512  ;;  %vm376_vm5 = vmor %vm374_vm4, %vm375_vm3 }
 0x381   :  { %v371_v11 = vsub.f32 1.0, %v370_v5  ;;  %1141 = vmatmul.msk.f32.vlgmr.msrb.gmra.mxu3 %vm136_vm8, %v239_v8 }
 0x382   :  { %1152 = vmatpush.xpose.msk.msrb.mxu3 %vm136_vm8, %v513_v9 }
 0x383   :  { %v372_v13 = vmul.f32 %v1206_v3, %v371_v11 }
 0x385   :  { %v373_v15 = vadd.f32 %v1206_v3, %v372_v13 }
 0x387   :  { %v377_v17 = vsel %vm376_vm5, %v1206_v3, %v373_v15 }
 0x388   :  { %v382_v18 = vsel %vm379_vm6, %v381_v16, %v377_v17 }
 0x389   :  { %v397_v19 = vmul.f32 %v1413_v30, %v382_v18 }
 0x38b   :  { %1146 = vmatmul.msk.f32.vlgmr.msra.gmra.mxu3 %vm136_vm8, %v397_v19 }
 0x393   :  { %1153 = vmatmul.msk.f32.vlgmr.msrb.gmra.mxu3 %vm136_vm8, %v1419_v34 }
 0x3b8   :  { %v356_v20 = vpop.xlane.xlu2 %355 }
 0x3b9   :  { %v358_v21 = vsub.f32 %v1424_v38, %v356_v20 }
 0x3bb   :  { %v361_v22 = vmul.f32 1.442695, %v358_v21 }
 0x3bd   :  { %1207 = vpow2.f32 %v361_v22 }
 0x3c0   :  { %v539_v47 = vpop.permute.xlu2 %538 }
 0x3c3   :  { %v1208_v23 = vpop.eup %1207 }
 0x3c4   :  { %v366_v24 = vsel %vm136_vm8, %v1208_v23, 0.0 }
 0x3c5   :  { %367 = vadd.xlane.f32.xlu0 %v366_v24 }
 0x3d9   :  { %540 = vrot.lane.b32.xlu0 %v1375_v58, %s1269_s24 }
 0x3e1   :  { %702 = vrot.lane.b32.xlu0 %v1370_v56, %s1270_s25 }
 0x3e9   :  { %730 = vrot.lane.b32.xlu0 %v1375_v58, %s1270_s25  ;;  %s1274_s25 = smov [#allocation2]  }
 0x3ea   :  { %s1120_s26 = sshll.u32 %s1274_s25, 4  ;;  %s1121_s26 = int_to_ptr.vmem [resolvable:$true] %s1120_s26 }
 0x3f6   :  { %v263_v26 = vpop.f32.mrf.mxu3 }
 0x404   :  { %v289_v27 = vpop.f32.mrf.mxu3 }
 0x40e   :  { %v422_v28 = vpop.f32.mrf.mxu3 }
 0x40f   :  { %1148 = vmatmul.msk.f32.vlgmr.msrb.gmra.mxu0 %vm136_vm8, %v422_v28 }
 0x416   :  { %v535_v29 = vpop.f32.mrf.mxu3 }
 0x417   :  { %v566_v30 = vsel %vm1390_vm9, %v535_v29, -1e+30 }
 0x418   :  { %v568_v31 = vsel %vm136_vm8, %v566_v30, -inf }
 0x419   :  { %569 = vmax.xlane.f32.xlu1 %v568_v31 }
 0x432   :  { %616 = vrot.lane.b32.xlu1 %v1370_v56, %s1271_s30 }
 0x438   :  { %v368_v33 = vpop.xlane.xlu0 %367 }
 0x439   :  { %1209 = vrcp.f32 %v368_v33  ;;  %v394_v38 = vand.u32 2147483648, %v368_v33  ;;  %v392_v40 = vand.u32 2147483647, %v368_v33  ;;  %vm388_vm10 = vweird.f32 %v368_v33 }
 0x43a   :  { %728 = vrot.lane.b32.xlu1 %v1375_v58, %s1272_s0 }
 0x43b   :  { %v395_v42 = vor.u32 1.1754944e-38, %v394_v38  ;;  %vm393_vm12 = vcmp.eq.f32.partialorder %v392_v40, 8.507059e+37 }
 0x43f   :  { %v1210_v34 = vpop.eup %1209 }
 0x440   :  { %v384_v35 = vmul.f32 %v1210_v34, %v368_v33  ;;  %vm389_vm7 = vweird.f32 %v1210_v34 }
 0x441   :  { %vm390_vm11 = vmor %vm388_vm10, %vm389_vm7 }
 0x442   :  { %v385_v37 = vsub.f32 1.0, %v384_v35 }
 0x444   :  { %v386_v39 = vmul.f32 %v1210_v34, %v385_v37 }
 0x446   :  { %v387_v41 = vadd.f32 %v1210_v34, %v386_v39 }
 0x448   :  { %v391_v43 = vsel %vm390_vm11, %v1210_v34, %v387_v41 }
 0x449   :  { %v396_v44 = vsel %vm393_vm12, %v395_v42, %v391_v43 }
 0x44a   :  { %v398_v45 = vmul.f32 %v1208_v23, %v396_v44 }
 0x44b   :  { %v541_v46 = vpop.permute.xlu0 %540 }
 0x44c   :  { %1147 = vmatmul.msk.f32.vlgmr.msra.gmra.mxu1 %vm136_vm8, %v398_v45 }
 0x44d   :  { %1154 = vmatpush.xpose.msk.msrb.mxu1 %vm136_vm8, %v541_v46 }
 0x453   :  { %v703_v48 = vpop.permute.xlu0 %702 }
 0x454   :  { %1155 = vmatmul.msk.f32.vlgmr.msrb.gmra.mxu1 %vm136_vm8, %v539_v47  ;;  %1160 = vmatpush.xpose.msk.msrb.mxu0 %vm136_vm8, %v703_v48 }
 0x45b   :  { %v731_v55 = vpop.permute.xlu0 %730 }
 0x48c   :  { %v570_v49 = vpop.xlane.xlu1 %569  ;;  %v475_v16 = vpop.f32.mrf.mxu0 }
 0x48d   :  { %v574_v50 = vsub.f32 %v566_v30, %v570_v49 }
 0x48f   :  { %v576_v51 = vmul.f32 1.442695, %v574_v50 }
 0x491   :  { %1211 = vpow2.f32 %v576_v51 }
 0x497   :  { %v1212_v52 = vpop.eup %1211 }
 0x498   :  { %v580_v53 = vsel %vm136_vm8, %v1212_v52, 0.0 }
 0x499   :  { %581 = vadd.xlane.f32.xlu2 %v580_v53 }
 0x4a4   :  { %v617_v54 = vpop.permute.xlu1 %616 }
 0x4a5   :  { %637 = vmatpush.msra.mxu3 %v617_v54 }
 0x4a7   :  { %1162 = vmatpush.xpose.msk.msrb.mxu3 %vm136_vm8, %v731_v55 }
 0x4ac   :  { %v729_v15 = vpop.permute.xlu1 %728 }
 0x4b1   :  { %700 = vrot.lane.b32.xlu2 %v1370_v56, %s1272_s0 }
 0x4c9   :  { %v448_v57 = vpop.f32.mrf.mxu1 }
 0x4ca   :  { %1149 = vmatmul.msk.f32.gmra.mxu0 %vm136_vm8, %v448_v57 }
 0x4d1   :  { %v563_v59 = vpop.f32.mrf.mxu1 }
 0x4d2   :  { %v567_v60 = vsel %vm1390_vm9, %v563_v59, -1e+30  ;;  %1150 = vmatmul.msk.f32.vlgmr.msra.gmra.mxu0 %vm136_vm8, %v263_v26 }
 0x4d3   :  { %v571_v61 = vsel %vm136_vm8, %v567_v60, -inf }
 0x4d4   :  { %572 = vmax.xlane.f32.xlu0 %v571_v61 }
 0x4da   :  { %1151 = vmatmul.msk.f32.gmra.mxu0 %vm136_vm8, %v289_v27  ;;  %v668_v27 = vld [vmem:[%s1615_s4 + $0x10] sm:$0xff] }
 0x4db   :  { %690 = vmatpush.msra.mxu2 %v668_v27  ;;  %v858_v27 = vld [vmem:[%s1615_s4 + $0x18] sm:$0xff] }
 0x50c   :  { %v582_v62 = vpop.xlane.xlu2 %581 }
 0x50d   :  { %1213 = vrcp.f32 %v582_v62  ;;  %v597_v5 = vand.u32 2147483648, %v582_v62  ;;  %v595_v8 = vand.u32 2147483647, %v582_v62  ;;  %vm591_vm14 = vweird.f32 %v582_v62 }
 0x50f   :  { %v598_v11 = vor.u32 1.1754944e-38, %v597_v5  ;;  %vm596_vm1 = vcmp.eq.f32.partialorder %v595_v8, 8.507059e+37 }
 0x513   :  { %v1214_v63 = vpop.eup %1213 }
 0x514   :  { %v587_v1 = vmul.f32 %v1214_v63, %v582_v62  ;;  %v701_v3 = vpop.permute.xlu2 %700  ;;  %vm592_vm13 = vweird.f32 %v1214_v63 }
 0x515   :  { %1161 = vmatmul.msk.f32.vlgmr.msrb.gmra.mxu0 %vm136_vm8, %v701_v3  ;;  %vm593_vm15 = vmor %vm591_vm14, %vm592_vm13 }
 0x516   :  { %v588_v4 = vsub.f32 1.0, %v587_v1 }
 0x518   :  { %v589_v7 = vmul.f32 %v1214_v63, %v588_v4 }
 0x51a   :  { %v590_v9 = vadd.f32 %v1214_v63, %v589_v7 }
 0x51c   :  { %v594_v12 = vsel %vm593_vm15, %v1214_v63, %v590_v9 }
 0x51d   :  { %v599_v13 = vsel %vm596_vm1, %v598_v11, %v594_v12 }
 0x51e   :  { %v614_v14 = vmul.f32 %v1212_v52, %v599_v13 }
 0x520   :  { %1156 = vmatmul.msk.f32.vlgmr.msra.gmra.mxu3 %vm136_vm8, %v614_v14 }
 0x521   :  { %880 = vmatpush.msra.mxu3 %v858_v27  ;;  %v1085_v27 = vld [vmem:[%s1618_s7 + $0x68] sm:$0xff] }
 0x528   :  { %1163 = vmatmul.msk.f32.vlgmr.msrb.gmra.mxu3 %vm136_vm8, %v729_v15 }
 0x547   :  { %v478_v17 = vpop.f32.mrf.mxu0  ;;  %v573_v18 = vpop.xlane.xlu0 %572 }
 0x548   :  { %v575_v19 = vsub.f32 %v567_v60, %v573_v18 }
 0x54a   :  { %v578_v20 = vmul.f32 1.442695, %v575_v19 }
 0x54c   :  { %1215 = vpow2.f32 %v578_v20 }
 0x54f   :  { %v504_v21 = vpop.f32.mrf.mxu0 }
 0x550   :  { %v1475_v22 = vadd.f32 %v504_v21, %v475_v16 }
 0x552   :  { %v1216_v23 = vpop.eup %1215 }
 0x553   :  { %v583_v24 = vsel %vm136_vm8, %v1216_v23, 0.0 }
 0x554   :  { %584 = vadd.xlane.f32.xlu0 %v583_v24 }
 0x557   :  { %v507_v25 = vpop.f32.mrf.mxu0 }
 0x558   :  { %v1478_v26 = vadd.f32 %v507_v25, %v478_v17 }
 0x568   :  { %642 = vrot.lane.b32.xlu0 %v1375_v58, %s1271_s30  ;;  %s1276_s30 = smov 8  }
 0x592   :  { %v725_v28 = vpop.f32.mrf.mxu0 }
 0x593   :  { %v756_v29 = vsel %vm1390_vm9, %v725_v28, -1e+30 }
 0x594   :  { %v758_v30 = vsel %vm136_vm8, %v756_v29, -inf }
 0x595   :  { %759 = vmax.xlane.f32.xlu2 %v758_v30 }
 0x5a3   :  { %v639_v31 = vpop.f32.mrf.mxu3 }
 0x5a4   :  { %1158 = vmatmul.msk.f32.vlgmr.msra.gmra.mxu2 %vm136_vm8, %v639_v31 }
 0x5ab   :  { %v753_v32 = vpop.f32.mrf.mxu3 }
 0x5ac   :  { %v757_v33 = vsel %vm1390_vm9, %v753_v32, -1e+30 }
 0x5ad   :  { %v761_v34 = vsel %vm136_vm8, %v757_v33, -inf }
 0x5ae   :  { %762 = vmax.xlane.f32.xlu1 %v761_v34 }
 0x5c7   :  { %v585_v35 = vpop.xlane.xlu0 %584 }
 0x5c8   :  { %1217 = vrcp.f32 %v585_v35  ;;  %v611_v40 = vand.u32 2147483648, %v585_v35  ;;  %v609_v42 = vand.u32 2147483647, %v585_v35  ;;  %vm605_vm3 = vweird.f32 %v585_v35 }
 0x5ca   :  { %v612_v44 = vor.u32 1.1754944e-38, %v611_v40  ;;  %vm610_vm5 = vcmp.eq.f32.partialorder %v609_v42, 8.507059e+37 }
 0x5ce   :  { %v1218_v37 = vpop.eup %1217 }
 0x5cf   :  { %v601_v38 = vmul.f32 %v1218_v37, %v585_v35  ;;  %vm606_vm2 = vweird.f32 %v1218_v37  ;;  %v894_v35 = vperm.slane %v1361_v36, 4 }
 0x5d0   :  { %vm607_vm4 = vmor %vm605_vm3, %vm606_vm2 }
 0x5d1   :  { %v602_v39 = vsub.f32 1.0, %v601_v38 }
 0x5d3   :  { %v603_v41 = vmul.f32 %v1218_v37, %v602_v39 }
 0x5d5   :  { %v604_v43 = vadd.f32 %v1218_v37, %v603_v41 }
 0x5d7   :  { %v608_v45 = vsel %vm607_vm4, %v1218_v37, %v604_v43 }
 0x5d8   :  { %v613_v6 = vsel %vm610_vm5, %v612_v44, %v608_v45 }
 0x5d9   :  { %v615_v46 = vmul.f32 %v1216_v23, %v613_v6 }
 0x5da   :  { %v643_v47 = vpop.permute.xlu0 %642 }
 0x5db   :  { %663 = vmatpush.msra.mxu1 %v643_v47 }
 0x5dc   :  { %1157 = vmatmul.msk.f32.vlgmr.msra.gmra.mxu1 %vm136_vm8, %v615_v46 }
 0x608   :  { %v760_v48 = vpop.xlane.xlu2 %759 }
 0x609   :  { %v764_v49 = vsub.f32 %v756_v29, %v760_v48 }
 0x60b   :  { %v766_v50 = vmul.f32 1.442695, %v764_v49 }
 0x60d   :  { %1219 = vpow2.f32 %v766_v50 }
 0x613   :  { %v1220_v51 = vpop.eup %1219 }
 0x614   :  { %v770_v52 = vsel %vm136_vm8, %v1220_v51, 0.0 }
 0x615   :  { %771 = vadd.xlane.f32.xlu2 %v770_v52 }
 0x621   :  { %v763_v53 = vpop.xlane.xlu1 %762 }
 0x622   :  { %v765_v54 = vsub.f32 %v757_v33, %v763_v53  ;;  %v950_v53 = vld [vmem:[%s1616_s5 + $0x18] sm:$0xff] }
 0x624   :  { %v768_v55 = vmul.f32 1.442695, %v765_v54  ;;  %v949_v54 = vld [vmem:[%s1616_s5 + $0x10] sm:$0xff] }
 0x626   :  { %1221 = vpow2.f32 %v768_v55  ;;  %v948_v55 = vld [vmem:[%s1616_s5 + $0x8] sm:$0xff] }
 0x627   :  { %v692_v30 = vpop.f32.mrf.mxu2 }
 0x628   :  { %v698_v31 = vadd.f32 %v692_v30, %v1475_v22  ;;  %v1083_v30 = vld [vmem:[%s1618_s7 + $0x58] sm:$0xff] }
 0x62c   :  { %v1222_v57 = vpop.eup %1221 }
 0x62d   :  { %806 = vrot.lane.b32.xlu2 %v1370_v56, %s1273_s11  ;;  %v773_v59 = vsel %vm136_vm8, %v1222_v57, 0.0 }
 0x62e   :  { %774 = vadd.xlane.f32.xlu1 %v773_v59 }
 0x647   :  { %832 = vrot.lane.b32.xlu1 %v1375_v58, %s1273_s11 }
 0x659   :  { %v665_v60 = vpop.f32.mrf.mxu1 }
 0x65a   :  { %1159 = vmatmul.msk.f32.gmra.mxu2 %vm136_vm8, %v665_v60 }
 0x688   :  { %v772_v61 = vpop.xlane.xlu2 %771 }
 0x689   :  { %1223 = vrcp.f32 %v772_v61  ;;  %v787_v4 = vand.u32 2147483648, %v772_v61  ;;  %v785_v7 = vand.u32 2147483647, %v772_v61  ;;  %vm781_vm6 = vweird.f32 %v772_v61 }
 0x68b   :  { %v788_v8 = vor.u32 1.1754944e-38, %v787_v4  ;;  %vm786_vm10 = vcmp.eq.f32.partialorder %v785_v7, 8.507059e+37  ;;  %v941_v7 = vperm.slane %v1361_v36, 2 }
 0x68f   :  { %v1224_v62 = vpop.eup %1223 }
 0x690   :  { %v777_v63 = vmul.f32 %v1224_v62, %v772_v61  ;;  %v807_v1 = vpop.permute.xlu2 %806  ;;  %vm782_vm9 = vweird.f32 %v1224_v62 }
 0x691   :  { %827 = vmatpush.msrb.mxu1 %v807_v1  ;;  %vm783_vm7 = vmor %vm781_vm6, %vm782_vm9 }
 0x692   :  { %v778_v3 = vsub.f32 1.0, %v777_v63 }
 0x693   :  { %973 = vmatpush.msra.mxu1 %v950_v53 }
 0x694   :  { %v779_v5 = vmul.f32 %v1224_v62, %v778_v3 }
 0x695   :  { %974 = vmatpush.msra.mxu1 %v949_v54  ;;  %v1073_v54 = vld [vmem:[%s1618_s7 + $0x8] sm:$0xff] }
 0x696   :  { %v780_v56 = vadd.f32 %v1224_v62, %v779_v5 }
 0x697   :  { %975 = vmatpush.msra.mxu1 %v948_v55 }
 0x698   :  { %v784_v9 = vsel %vm783_vm7, %v1224_v62, %v780_v56 }
 0x699   :  { %v789_v58 = vsel %vm786_vm10, %v788_v8, %v784_v9  ;;  %v944_v9 = vperm.slane %v1361_v36, 3 }
 0x69a   :  { %v804_v11 = vmul.f32 %v1220_v51, %v789_v58 }
 0x69c   :  { %1164 = vmatmul.msk.f32.vlgmr.msrb.gmra.mxu1 %vm136_vm8, %v804_v11 }
 0x6a1   :  { %v775_v12 = vpop.xlane.xlu1 %774 }
 0x6a2   :  { %1225 = vrcp.f32 %v775_v12  ;;  %v801_v18 = vand.u32 2147483648, %v775_v12  ;;  %vm795_vm12 = vweird.f32 %v775_v12  ;;  %v799_v19 = vand.u32 2147483647, %v775_v12 }
 0x6a4   :  { %v802_v21 = vor.u32 1.1754944e-38, %v801_v18  ;;  %vm800_vm14 = vcmp.eq.f32.partialorder %v799_v19, 8.507059e+37 }
 0x6a8   :  { %v1226_v13 = vpop.eup %1225 }
 0x6a9   :  { %v791_v14 = vmul.f32 %v1226_v13, %v775_v12  ;;  %vm796_vm11 = vweird.f32 %v1226_v13 }
 0x6aa   :  { %vm797_vm13 = vmor %vm795_vm12, %vm796_vm11 }
 0x6ab   :  { %v792_v15 = vsub.f32 1.0, %v791_v14 }
 0x6ad   :  { %v793_v16 = vmul.f32 %v1226_v13, %v792_v15 }
 0x6af   :  { %v794_v17 = vadd.f32 %v1226_v13, %v793_v16 }
 0x6b1   :  { %v798_v20 = vsel %vm797_vm13, %v1226_v13, %v794_v17 }
 0x6b2   :  { %v803_v23 = vsel %vm800_vm14, %v802_v21, %v798_v20 }
 0x6b3   :  { %v805_v25 = vmul.f32 %v1222_v57, %v803_v23  ;;  %v947_v57 = vld [vmem:[%s1616_s5] sm:$0xff] }
 0x6b4   :  { %976 = vmatpush.msra.mxu1 %v947_v57  ;;  %v1072_v57 = vld [vmem:[%s1618_s7] sm:$0xff] }
 0x6b9   :  { %v833_v24 = vpop.permute.xlu1 %832 }
 0x6ba   :  { %853 = vmatpush.msra.mxu0 %v833_v24 }
 0x6bb   :  { %1165 = vmatmul.msk.f32.vlgmr.msra.gmra.mxu0 %vm136_vm8, %v805_v25  ;;  %v1086_v25 = vld [vmem:[%s1618_s7 + $0x70] sm:$0xff] }
 0x6dd   :  { %v695_v40 = vpop.f32.mrf.mxu2 }
 0x6de   :  { %v699_v41 = vadd.f32 %v695_v40, %v1478_v26 }
 0x719   :  { %v829_v28 = vpop.f32.mrf.mxu1 }
 0x71a   :  { %1166 = vmatmul.msk.f32.vlgmr.msra.gmra.mxu3 %vm136_vm8, %v829_v28  ;;  %v1188_v28 = vld [vmem:[%s1617_s6] ss:$0 sm:$0xff] }
 0x738   :  { %v855_v29 = vpop.f32.mrf.mxu0 }
 0x739   :  { %1167 = vmatmul.msk.f32.gmra.mxu3 %vm136_vm8, %v855_v29  ;;  %v1084_v29 = vld [vmem:[%s1618_s7 + $0x60] sm:$0xff] }
 0x79d   :  { %v882_v32 = vpop.f32.mrf.mxu3 }
 0x79e   :  { %v888_v33 = vadd.f32 %v882_v32, %v698_v31 }
 0x7a0   :  { %v890_v34 = vmul.f32 0.17677669, %v888_v33  ;;  %v1082_v33 = vld [vmem:[%s1618_s7 + $0x50] sm:$0xff] }
 0x7a2   :  { %v892_v37 = vadd.f32 %v890_v34, %v1325_v0 }
 0x7a4   :  { %v1508_v38 = vadd.f32 %v894_v35, %v892_v37 }
 0x7a6   :  { %v897_v39 = vsel %vm33_vm0, %v1508_v38, 0.0 }
 0x7a7   :  { %898 = vadd.xlane.f32.xlu0 %v897_v39  ;;  %v1080_v39 = vld [vmem:[%s1618_s7 + $0x40] sm:$0xff] }
 0x7bc   :  { %v885_v42 = vpop.f32.mrf.mxu3 }
 0x7bd   :  { %v889_v43 = vadd.f32 %v885_v42, %v699_v41  ;;  %v1079_v41 = vld [vmem:[%s1618_s7 + $0x38] sm:$0xff] }
 0x7bf   :  { %v891_v44 = vmul.f32 0.17677669, %v889_v43 }
 0x7c1   :  { %v893_v22 = vadd.f32 %v891_v44, %v1332_v2  ;;  %v1078_v44 = vld [vmem:[%s1618_s7 + $0x30] sm:$0xff] }
 0x7c3   :  { %v1514_v45 = vadd.f32 %v894_v35, %v893_v22  ;;  %v1081_v35 = vld [vmem:[%s1618_s7 + $0x48] sm:$0xff] }
 0x7c5   :  { %v900_v6 = vsel %vm33_vm0, %v1514_v45, 0.0 }
 0x7c6   :  { %901 = vadd.xlane.f32.xlu2 %v900_v6 }
 0x81a   :  { %v899_v0 = vpop.xlane.xlu0 %898 }
 0x81b   :  { %v903_v46 = vmul.f32 %v899_v0, %v1336_v10  ;;  %v1077_v0 = vld [vmem:[%s1618_s7 + $0x28] sm:$0xff] }
 0x81d   :  { %v905_v47 = vsub.f32 %v1508_v38, %v903_v46 }
 0x81f   :  { %v907_v48 = vmul.f32 %v905_v47, %v905_v47 }
 0x821   :  { %v909_v49 = vsel %vm33_vm0, %v907_v48, 0.0  ;;  %v1076_v48 = vld [vmem:[%s1618_s7 + $0x20] sm:$0xff] }
 0x822   :  { %910 = vadd.xlane.f32.xlu1 %v909_v49 }
 0x839   :  { %v902_v26 = vpop.xlane.xlu2 %901 }
 0x83a   :  { %v904_v50 = vmul.f32 %v902_v26, %v1336_v10 }
 0x83c   :  { %v906_v2 = vsub.f32 %v1514_v45, %v904_v50  ;;  %v1075_v50 = vld [vmem:[%s1618_s7 + $0x18] sm:$0xff] }
 0x83e   :  { %v908_v51 = vmul.f32 %v906_v2, %v906_v2 }
 0x840   :  { %v912_v52 = vsel %vm33_vm0, %v908_v51, 0.0  ;;  %v1074_v51 = vld [vmem:[%s1618_s7 + $0x10] sm:$0xff] }
 0x841   :  { %913 = vadd.xlane.f32.xlu0 %v912_v52 }
 0x895   :  { %v911_v59 = vpop.xlane.xlu1 %910 }
 0x896   :  { %v915_v60 = vmul.f32 %v911_v59, %v1336_v10 }
 0x898   :  { %v917_v61 = vadd.f32 1e-05, %v915_v60 }
 0x89a   :  { %1227 = vrsqrt.f32 %v917_v61  ;;  %vm925_vm15 = vweird.f32 %v917_v61 }
 0x8a0   :  { %v1228_v62 = vpop.eup %1227 }
 0x8a1   :  { %v920_v63 = vmul.f32 %v1228_v62, %v917_v61  ;;  %vm926_vm8 = vweird.f32 %v1228_v62 }
 0x8a2   :  { %vm927_vm1 = vmor %vm925_vm15, %vm926_vm8 }
 0x8a3   :  { %v921_v1 = vmul.f32 %v1228_v62, %v920_v63 }
 0x8a5   :  { %v922_v3 = vmul.f32 0.5, %v921_v1 }
 0x8a7   :  { %v923_v4 = vsub.f32 1.5, %v922_v3 }
 0x8a9   :  { %v924_v5 = vmul.f32 %v1228_v62, %v923_v4 }
 0x8ab   :  { %v928_v56 = vsel %vm927_vm1, %v1228_v62, %v924_v5 }
 0x8ac   :  { %v939_v8 = vmul.f32 %v928_v56, %v905_v47 }
 0x8ae   :  { %v942_v58 = vmul.f32 %v941_v7, %v939_v8 }
 0x8b0   :  { %v945_v11 = vadd.f32 %v944_v9, %v942_v58 }
 0x8b2   :  { %1168 = vmatmul.msk.f32.vlgmr.msra.gmra.mxu1 %vm33_vm0, %v945_v11 }
 0x8b4   :  { %v914_v12 = vpop.xlane.xlu0 %913 }
 0x8b5   :  { %v916_v13 = vmul.f32 %v914_v12, %v1336_v10  ;;  %v1087_v10 = vld [vmem:[%s1618_s7 + $0x78] sm:$0xff] }
 0x8b6   :  { %1089 = vmatpush.msrb.mxu2 %v1087_v10 }
 0x8b7   :  { %v918_v14 = vadd.f32 1e-05, %v916_v13 }
 0x8b8   :  { %1090 = vmatpush.msrb.mxu2 %v1086_v25 }
 0x8b9   :  { %1229 = vrsqrt.f32 %v918_v14  ;;  %vm935_vm3 = vweird.f32 %v918_v14 }
 0x8ba   :  { %1091 = vmatpush.msrb.mxu2 %v1085_v27 }
 0x8bc   :  { %1092 = vmatpush.msrb.mxu2 %v1084_v29 }
 0x8be   :  { %1093 = vmatpush.msrb.mxu2 %v1083_v30 }
 0x8bf   :  { %v1230_v15 = vpop.eup %1229 }
 0x8c0   :  { %v930_v16 = vmul.f32 %v1230_v15, %v918_v14  ;;  %vm936_vm2 = vweird.f32 %v1230_v15  ;;  %1094 = vmatpush.msrb.mxu2 %v1082_v33 }
 0x8c1   :  { %vm937_vm4 = vmor %vm935_vm3, %vm936_vm2 }
 0x8c2   :  { %v931_v17 = vmul.f32 %v1230_v15, %v930_v16  ;;  %1095 = vmatpush.msrb.mxu2 %v1081_v35 }
 0x8c4   :  { %v932_v18 = vmul.f32 0.5, %v931_v17  ;;  %1096 = vmatpush.msrb.mxu2 %v1080_v39 }
 0x8c6   :  { %v933_v19 = vsub.f32 1.5, %v932_v18  ;;  %1097 = vmatpush.msrb.mxu2 %v1079_v41 }
 0x8c8   :  { %v934_v20 = vmul.f32 %v1230_v15, %v933_v19  ;;  %1098 = vmatpush.msrb.mxu2 %v1078_v44 }
 0x8ca   :  { %v938_v21 = vsel %vm937_vm4, %v1230_v15, %v934_v20  ;;  %1099 = vmatpush.msrb.mxu2 %v1077_v0 }
 0x8cb   :  { %v940_v36 = vmul.f32 %v938_v21, %v906_v2 }
 0x8cc   :  { %1100 = vmatpush.msrb.mxu2 %v1076_v48 }
 0x8cd   :  { %v943_v23 = vmul.f32 %v941_v7, %v940_v36 }
 0x8ce   :  { %1101 = vmatpush.msrb.mxu2 %v1075_v50 }
 0x8cf   :  { %v946_v24 = vadd.f32 %v944_v9, %v943_v23 }
 0x8d0   :  { %1102 = vmatpush.msrb.mxu2 %v1074_v51 }
 0x8d1   :  { %1169 = vmatmul.msk.f32.gmra.mxu1 %vm33_vm0, %v946_v24 }
 0x8d2   :  { %1103 = vmatpush.msrb.mxu2 %v1073_v54 }
 0x8d4   :  { %1104 = vmatpush.msrb.mxu2 %v1072_v57 }
 0x92f   :  { %v978_v31 = vpop.f32.mrf.mxu1 }
 0x930   :  { %v1560_v32 = vadd.f32 %v1188_v28, %v978_v31 }
 0x932   :  { %v986_v34 = vmul.f32 0.70710677, %v1560_v32  ;;  %v984_v33 = vmul.f32 0.5, %v1560_v32 }
 0x934   :  { %v988_v37 = vmul.f32 %v986_v34, %v986_v34 }
 0x936   :  { %v989_v40 = vmin.f32 %v988_v37, 16.0 }
 0x938   :  { %v990_v42 = vmul.f32 2.1237322e-06, %v989_v40  ;;  %v1001_v43 = vmul.f32 3.8918573e-05, %v989_v40 }
 0x93a   :  { %v991_v22 = vadd.f32 0.00028619796, %v990_v42  ;;  %v1002_v6 = vadd.f32 0.001143296, %v1001_v43 }
 0x93c   :  { %v992_v46 = vmul.f32 %v991_v22, %v989_v40  ;;  %v1003_v47 = vmul.f32 %v1002_v6, %v989_v40 }
 0x93e   :  { %v993_v49 = vadd.f32 0.0036580483, %v992_v46  ;;  %v1004_v26 = vadd.f32 0.014752088, %v1003_v47 }
 0x940   :  { %v1005_v2 = vmul.f32 %v1004_v26, %v989_v40  ;;  %v994_v52 = vmul.f32 %v993_v49, %v989_v40 }
 0x942   :  { %v1006_v53 = vadd.f32 0.112945676, %v1005_v2  ;;  %v995_v59 = vadd.f32 0.05243302, %v994_v52 }
 0x944   :  { %v1007_v55 = vmul.f32 %v1006_v53, %v989_v40  ;;  %v996_v62 = vmul.f32 %v995_v59, %v989_v40 }
 0x946   :  { %v1008_v60 = vadd.f32 0.4994258, %v1007_v55  ;;  %v997_v1 = vadd.f32 0.18741608, %v996_v62  ;;  %v1235_v62 = vld [vmem:[%s1612_s1] sm:$0x3f] }
 0x947   :  { %s1275_s1 = smov 128  }
 0x948   :  { %v1009_v61 = vmul.f32 %v1008_v60, %v989_v40  ;;  %v998_v56 = vmul.f32 %v997_v1, %v989_v40 }
 0x94a   :  { %v1010_v63 = vadd.f32 1.0, %v1009_v61  ;;  %v999_v12 = vadd.f32 1.1283791, %v998_v56 }
 0x94c   :  { %1231 = vrcp.f32 %v1010_v63  ;;  %v1020_v13 = vand.u32 2147483647, %v1010_v63  ;;  %v1022_v14 = vand.u32 2147483648, %v1010_v63  ;;  %vm1016_vm9 = vweird.f32 %v1010_v63 }
 0x94d   :  { %v1000_v21 = vmul.f32 %v999_v12, %v986_v34 }
 0x94e   :  { %v981_v3 = vpop.f32.mrf.mxu1  ;;  %v1023_v36 = vor.u32 1.1754944e-38, %v1022_v14  ;;  %vm1021_vm7 = vcmp.eq.f32.partialorder %v1020_v13, 8.507059e+37 }
 0x94f   :  { %v1596_v4 = vadd.f32 %v1188_v28, %v981_v3 }
 0x951   :  { %v987_v5 = vmul.f32 0.70710677, %v1596_v4  ;;  %v985_v59 = vmul.f32 0.5, %v1596_v4 }
 0x952   :  { %v1232_v7 = vpop.eup %1231 }
 0x953   :  { %v1012_v8 = vmul.f32 %v1232_v7, %v1010_v63  ;;  %v1028_v9 = vmul.f32 %v987_v5, %v987_v5  ;;  %vm1017_vm5 = vweird.f32 %v1232_v7  ;;  %v1088_v63 = vperm.slane %v1235_v62, 5 }
 0x954   :  { %vm1018_vm6 = vmor %vm1016_vm9, %vm1017_vm5 }
 0x955   :  { %v1013_v58 = vsub.f32 1.0, %v1012_v8  ;;  %v1029_v11 = vmin.f32 %v1028_v9, 16.0 }
 0x957   :  { %v1014_v15 = vmul.f32 %v1232_v7, %v1013_v58  ;;  %v1030_v16 = vmul.f32 2.1237322e-06, %v1029_v11  ;;  %v1041_v17 = vmul.f32 3.8918573e-05, %v1029_v11 }
 0x959   :  { %v1015_v18 = vadd.f32 %v1232_v7, %v1014_v15  ;;  %v1031_v19 = vadd.f32 0.00028619796, %v1030_v16  ;;  %v1042_v20 = vadd.f32 0.001143296, %v1041_v17 }
 0x95b   :  { %v1019_v23 = vsel %vm1018_vm6, %v1232_v7, %v1015_v18  ;;  %v1032_v24 = vmul.f32 %v1031_v19, %v1029_v11  ;;  %v1043_v10 = vmul.f32 %v1042_v20, %v1029_v11 }
 0x95c   :  { %v1024_v25 = vsel %vm1021_vm7, %v1023_v36, %v1019_v23 }
 0x95d   :  { %v1025_v27 = vmul.f32 %v1024_v25, %v1000_v21  ;;  %v1044_v28 = vadd.f32 0.014752088, %v1043_v10  ;;  %v1033_v29 = vadd.f32 0.0036580483, %v1032_v24 }
 0x95f   :  { %v1170_v30 = vclamps-f32 %v1025_v27, 1.0  ;;  %v1045_v31 = vmul.f32 %v1044_v28, %v1029_v11  ;;  %v1034_v39 = vmul.f32 %v1033_v29, %v1029_v11 }
 0x961   :  { %v1068_v35 = vadd.f32 1.0, %v1170_v30  ;;  %v1046_v37 = vadd.f32 0.112945676, %v1045_v31  ;;  %v1035_v42 = vadd.f32 0.05243302, %v1034_v39 }
 0x963   :  { %v1070_v40 = vmul.f32 %v1068_v35, %v984_v33  ;;  %v1047_v41 = vmul.f32 %v1046_v37, %v1029_v11  ;;  %v1036_v22 = vmul.f32 %v1035_v42, %v1029_v11 }
 0x965   :  { %1105 = vmatmul.f32.vlgmr.msrb.gmra.mxu2 %v1070_v40  ;;  %v1048_v34 = vadd.f32 0.4994258, %v1047_v41  ;;  %v1037_v6 = vadd.f32 0.18741608, %v1036_v22 }
 0x967   :  { %v1049_v43 = vmul.f32 %v1048_v34, %v1029_v11  ;;  %v1038_v46 = vmul.f32 %v1037_v6, %v1029_v11 }
 0x969   :  { %v1050_v44 = vadd.f32 1.0, %v1049_v43  ;;  %v1039_v26 = vadd.f32 1.1283791, %v1038_v46 }
 0x96b   :  { %1233 = vrcp.f32 %v1050_v44  ;;  %v1062_v49 = vand.u32 2147483648, %v1050_v44  ;;  %v1060_v50 = vand.u32 2147483647, %v1050_v44  ;;  %vm1056_vm11 = vweird.f32 %v1050_v44 }
 0x96c   :  { %v1040_v52 = vmul.f32 %v1039_v26, %v987_v5 }
 0x96d   :  { %v1063_v51 = vor.u32 1.1754944e-38, %v1062_v49  ;;  %vm1061_vm13 = vcmp.eq.f32.partialorder %v1060_v50, 8.507059e+37 }
 0x971   :  { %v1234_v0 = vpop.eup %1233 }
 0x972   :  { %v1052_v47 = vmul.f32 %v1234_v0, %v1050_v44  ;;  %vm1057_vm10 = vweird.f32 %v1234_v0 }
 0x973   :  { %vm1058_vm12 = vmor %vm1056_vm11, %vm1057_vm10 }
 0x974   :  { %v1053_v48 = vsub.f32 1.0, %v1052_v47 }
 0x976   :  { %v1054_v32 = vmul.f32 %v1234_v0, %v1053_v48 }
 0x978   :  { %v1055_v2 = vadd.f32 %v1234_v0, %v1054_v32 }
 0x97a   :  { %v1059_v53 = vsel %vm1058_vm12, %v1234_v0, %v1055_v2 }
 0x97b   :  { %v1064_v54 = vsel %vm1061_vm13, %v1063_v51, %v1059_v53 }
 0x97c   :  { %v1065_v55 = vmul.f32 %v1064_v54, %v1040_v52 }
 0x97e   :  { %v1171_v57 = vclamps-f32 %v1065_v55, 1.0 }
 0x980   :  { %v1069_v60 = vadd.f32 1.0, %v1171_v57 }
 0x982   :  { %v1071_v61 = vmul.f32 %v1069_v60, %v985_v59 }
 0x984   :  { %1108 = vmatmul.f32.gmra.mxu2 %v1071_v61 }
 0x9e8   :  { %v1106_v1 = vpop.f32.mrf.mxu2 }
 0x9e9   :  { %v1107_v3 = vadd.f32 %v1106_v1, %v1088_v63 }
 0x9eb   :  { %v1112_v7 = vadd.f32 %v1107_v3, %v1508_v38 }
 0x9ed   :  { %1114 = vst.msk [vmem:[#allocation2] sm:$0xff] %vm33_vm0, %v1112_v7 }
 0xa07   :  { %v1109_v4 = vpop.f32.mrf.mxu2 }
 0xa08   :  { %v1110_v5 = vadd.f32 %v1109_v4, %v1088_v63 }
 0xa0a   :  { %v1113_v56 = vadd.f32 %v1110_v5, %v1514_v45 }
 0xa0c   :  { %1115 = vst.msk [vmem:[#allocation2 + $0x8] sm:$0xff] %vm33_vm0, %v1113_v56 }
 0xa0d   :  { %1128 = dma.vmem_to_hbm [thread:$0]  %s1121_s26, 256, %s1123_s29, [#allocation3], %s1275_s1, %s1275_s1, %s1276_s30  }
 0xa0e   :  { %1260 = dma.done.wait [#allocation3], 256  }
 0xa0f   :  { %1261 = vsyncadd [#allocation3], 4294967040 }
 0xa10   :  { %1133 = vsyncpa [#allocation3], 1 }

</bundles_post_ra>
